<compile_context>
chip_gen: v5e
topology: v5e:2x2
jax: 0.10.0
libtpu: 0.0.40
codegen_flags: <defaults>
</compile_context>

<pallas_src>
import functools

import jax
import jax.numpy as jnp
from jax import lax
from jax.experimental import pallas as pl
from jax.experimental.pallas import tpu as pltpu


def _msa_kernel(x_ref, gamma_ref, beta_ref,
                wq_ref, wk_ref, wv_ref, bq_ref, bk_ref, bv_ref,
                wo_ref, bo_ref, o_ref, *, num_heads: int, eps: float,
                compute_dtype):
    Bt, S, E = x_ref.shape
    H = num_heads
    Dh = E // H
    M = Bt * S
    f32 = jnp.float32
    exact = jnp.dtype(compute_dtype) == jnp.dtype(jnp.float32)

    # ---- LayerNorm over the embedding dim (f32), on the tall (M, E) slab ----
    x = x_ref[...].reshape(M, E).astype(f32)              # leading-dim collapse: free
    mean = jnp.mean(x, axis=-1, keepdims=True)
    xc = x - mean
    var = jnp.mean(xc * xc, axis=-1, keepdims=True)
    xn = xc * lax.rsqrt(var + eps)
    xn = xn * gamma_ref[...].astype(f32) + beta_ref[...].astype(f32)

    xn_c = xn.astype(compute_dtype)                        # MXU input dtype

    # ---- Per-head attention + accumulated output projection -----------------
    # H is small and static (ViT: 4-12); the loop is unrolled at trace time.
    # All per-head splits live in the (host-prepared) weight slabs, so the
    # kernel never slices activations along the lane axis.
    acc = jnp.zeros((M, E), f32)
    for h in range(H):
        # Projections: (M, E) @ (E, Dh), clean (1,0) contraction.
        qh = (jnp.dot(xn_c, wq_ref[h], preferred_element_type=f32)
              + bq_ref[h]).astype(compute_dtype)           # 1/sqrt(Dh) already folded
        kh = (jnp.dot(xn_c, wk_ref[h], preferred_element_type=f32)
              + bk_ref[h]).astype(compute_dtype)
        vh = (jnp.dot(xn_c, wv_ref[h], preferred_element_type=f32)
              + bv_ref[h]).astype(compute_dtype)

        # Leading-dim split (Bt*S, Dh) -> (Bt, S, Dh): cheap, S is the sublane dim.
        q3 = qh.reshape(Bt, S, Dh)
        k3 = kh.reshape(Bt, S, Dh)
        v3 = vh.reshape(Bt, S, Dh)

        # Batched (over Bt) scaled-dot-product attention, f32 accumulation.
        scores = jnp.einsum('bqd,bkd->bqk', q3, k3,
                            preferred_element_type=f32)    # (Bt, S, S)
        m = jnp.max(scores, axis=-1, keepdims=True)
        p = jnp.exp(scores - m)
        denom = jnp.sum(p, axis=-1, keepdims=True)
        if exact:
            attn = p / denom
        else:
            attn = p * pl.reciprocal(denom, approx=True)   # EUP slot, frees VALU

        oh = jnp.einsum('bqk,bkd->bqd', attn.astype(compute_dtype), v3,
                        preferred_element_type=f32)        # (Bt, S, Dh)

        # Output projection accumulated per head (no concat of head outputs).
        acc = acc + jnp.dot(oh.reshape(M, Dh).astype(compute_dtype), wo_ref[h],
                            preferred_element_type=f32)

    out = acc + bo_ref[...].astype(f32)
    o_ref[...] = out.reshape(Bt, S, E).astype(o_ref.dtype)


def _default_block_b(B: int, S: int) -> int:
    """Largest divisor of B that keeps the per-step slab modest and, when
    possible, leaves >=2 grid steps (so v7x megacore still has 2 parallel
    steps to split)."""
    max_rows = 2048   # rows of the (Bt*S, E) slab; conservative for 32 MiB scoped VMEM
    cand = [d for d in range(1, B + 1) if B % d == 0 and d * S <= max_rows]
    best = cand[-1]
    two_step = [d for d in cand if B // d >= 2]
    if two_step:
        best = two_step[-1]
    return best


def msa_block(x, gamma, beta, wqkv, bqkv, wo, bo, *, num_heads,
              eps=1e-5, compute_dtype=jnp.bfloat16, block_b=None):
    """LayerNorm + multi-head self-attention (PyTorch semantics).

    compute_dtype: dtype fed to the MXU (weights resident in this dtype too).
      * jnp.float32  -> bit-faithful to the PyTorch f32 module.
      * jnp.bfloat16 -> fast path for v6e/v7x (f32 accumulation kept).
    """
    B, S, E = x.shape
    H = num_heads
    assert E % H == 0
    Dh = E // H
    if block_b is None:
        block_b = _default_block_b(B, S)
    assert B % block_b == 0, (B, block_b)

    f32 = jnp.float32
    scale = 1.0 / float(Dh) ** 0.5

    # ---- Host-side (one-time) weight prep: split per head, pre-transpose, ----
    # ---- fold the softmax scale into the Q projection.                    ----
    wq, wk, wv = wqkv[0:E], wqkv[E:2 * E], wqkv[2 * E:3 * E]      # (E, E) each
    bq, bk, bv = bqkv[0:E], bqkv[E:2 * E], bqkv[2 * E:3 * E]

    def heads_in(w):   # torch (E_out, E_in) -> (H, E_in, Dh)
        return jnp.transpose(w.reshape(H, Dh, E), (0, 2, 1))

    wq_h = heads_in(wq * scale).astype(compute_dtype)
    wk_h = heads_in(wk).astype(compute_dtype)
    wv_h = heads_in(wv).astype(compute_dtype)
    bq_h = (bq * scale).reshape(H, 1, Dh).astype(f32)
    bk_h = bk.reshape(H, 1, Dh).astype(f32)
    bv_h = bv.reshape(H, 1, Dh).astype(f32)
    wo_h = jnp.transpose(wo, (1, 0)).reshape(H, Dh, E).astype(compute_dtype)
    bo_2d = bo.reshape(1, E).astype(f32)
    gamma_2d = gamma.reshape(1, E).astype(f32)
    beta_2d = beta.reshape(1, E).astype(f32)

    kernel = functools.partial(_msa_kernel, num_heads=H, eps=eps,
                               compute_dtype=compute_dtype)

    const3 = lambda b: (0, 0, 0)
    const2 = lambda b: (0, 0)

    grid_spec = pltpu.PrefetchScalarGridSpec(
        num_scalar_prefetch=0,
        grid=(B // block_b,),
        in_specs=[
            pl.BlockSpec((block_b, S, E), lambda b: (b, 0, 0)),   # x
            pl.BlockSpec((1, E), const2),                         # ln gamma
            pl.BlockSpec((1, E), const2),                         # ln beta
            pl.BlockSpec((H, E, Dh), const3),                     # Wq (scaled, per head)
            pl.BlockSpec((H, E, Dh), const3),                     # Wk
            pl.BlockSpec((H, E, Dh), const3),                     # Wv
            pl.BlockSpec((H, 1, Dh), const3),                     # bq (scaled)
            pl.BlockSpec((H, 1, Dh), const3),                     # bk
            pl.BlockSpec((H, 1, Dh), const3),                     # bv
            pl.BlockSpec((H, Dh, E), const3),                     # Wo^T (per head)
            pl.BlockSpec((1, E), const2),                         # bo
        ],
        out_specs=pl.BlockSpec((block_b, S, E), lambda b: (b, 0, 0)),
    )

    return pl.pallas_call(
        kernel,
        out_shape=jax.ShapeDtypeStruct((B, S, E), x.dtype),
        grid_spec=grid_spec,
        compiler_params=pltpu.CompilerParams(
            dimension_semantics=("parallel",)),
    )(x, gamma_2d, beta_2d, wq_h, wk_h, wv_h, bq_h, bk_h, bv_h, wo_h, bo_2d)


def msa_reference(x, gamma, beta, wqkv, bqkv, wo, bo, *, num_heads, eps=1e-5):
    """Pure-JAX reference mirroring PyTorch semantics (for validation)."""
    B, S, E = x.shape
    Dh = E // num_heads
    mean = jnp.mean(x, axis=-1, keepdims=True)
    var = jnp.mean((x - mean) ** 2, axis=-1, keepdims=True)
    xn = (x - mean) / jnp.sqrt(var + eps) * gamma + beta
    qkv = jnp.einsum("bse,fe->bsf", xn, wqkv) + bqkv
    q, k, v = jnp.split(qkv, 3, axis=-1)
    q = q.reshape(B, S, num_heads, Dh).transpose(0, 2, 1, 3)
    k = k.reshape(B, S, num_heads, Dh).transpose(0, 2, 1, 3)
    v = v.reshape(B, S, num_heads, Dh).transpose(0, 2, 1, 3)
    scores = jnp.einsum("bhqd,bhkd->bhqk", q, k) / (Dh ** 0.5)
    attn = jax.nn.softmax(scores, axis=-1)
    o = jnp.einsum("bhqk,bhkd->bhqd", attn, v)
    o = o.transpose(0, 2, 1, 3).reshape(B, S, E)
    return jnp.einsum("bse,fe->bsf", o, wo) + bo


if __name__ == "__main__":
    # Small shapes consistent with the module: embedding_dim=32, num_heads=4,
    # seq=8; batch=8 so the batch-blocking (Bt=4, grid=2) is exercised.
    B, S, E, H = 8, 8, 32, 4
    key = jax.random.PRNGKey(0)
    kx, k1, k2, k3, k4, k5, k6 = jax.random.split(key, 7)

    x = jax.random.normal(kx, (B, S, E), dtype=jnp.float32)
    gamma = 1.0 + 0.1 * jax.random.normal(k1, (E,), dtype=jnp.float32)
    beta = 0.1 * jax.random.normal(k2, (E,), dtype=jnp.float32)
    wqkv = jax.random.normal(k3, (3 * E, E), dtype=jnp.float32) * (1.0 / E ** 0.5)
    bqkv = 0.02 * jax.random.normal(k4, (3 * E,), dtype=jnp.float32)
    wo = jax.random.normal(k5, (E, E), dtype=jnp.float32) * (1.0 / E ** 0.5)
    bo = 0.02 * jax.random.normal(k6, (E,), dtype=jnp.float32)

    ref = msa_reference(x, gamma, beta, wqkv, bqkv, wo, bo, num_heads=H)

    # Exact-semantics path (f32 MXU inputs) -> must match PyTorch math tightly.
    out_f32 = jax.block_until_ready(
        msa_block(x, gamma, beta, wqkv, bqkv, wo, bo, num_heads=H,
                  compute_dtype=jnp.float32))
    assert out_f32.shape == (B, S, E)
    err_f32 = float(jnp.max(jnp.abs(out_f32 - ref)))
    assert err_f32 < 1e-4, err_f32

    # Fast path (bf16 MXU inputs, f32 accumulation) for v6e/v7x throughput.
    out_bf16 = jax.block_until_ready(
        msa_block(x, gamma, beta, wqkv, bqkv, wo, bo, num_heads=H,
                  compute_dtype=jnp.bfloat16))
    err_bf16 = float(jnp.max(jnp.abs(out_bf16 - ref)))
    assert err_bf16 < 1e-1, err_bf16

    print("KERNEL_OK")
</pallas_src>

<mosaic_0001>
module attributes {stable_mosaic.version = 11 : i64} {
  func.func @_msa_kernel(%arg0: i32, %arg1: memref<4x8x32xf32, #tpu.memory_space<vmem>>, %arg2: memref<1x32xf32, #tpu.memory_space<vmem>>, %arg3: memref<1x32xf32, #tpu.memory_space<vmem>>, %arg4: memref<4x32x8xf32, #tpu.memory_space<vmem>>, %arg5: memref<4x32x8xf32, #tpu.memory_space<vmem>>, %arg6: memref<4x32x8xf32, #tpu.memory_space<vmem>>, %arg7: memref<4x1x8xf32, #tpu.memory_space<vmem>>, %arg8: memref<4x1x8xf32, #tpu.memory_space<vmem>>, %arg9: memref<4x1x8xf32, #tpu.memory_space<vmem>>, %arg10: memref<4x8x32xf32, #tpu.memory_space<vmem>>, %arg11: memref<1x32xf32, #tpu.memory_space<vmem>>, %arg12: memref<4x8x32xf32, #tpu.memory_space<vmem>>) attributes {dimension_semantics = [#tpu.dimension_semantics<parallel>], iteration_bounds = array<i64: 2>, scalar_prefetch = 0 : i64, scratch_operands = 0 : i64, tpu.core_type = #tpu.core_type<tc>, window_params = [{transform_indices = @transform_0, window_bounds = array<i64: 4, 8, 32>}, {pipeline_mode = #tpu.pipeline_mode<synchronous>, transform_indices = @transform_1, window_bounds = array<i64: 1, 32>}, {pipeline_mode = #tpu.pipeline_mode<synchronous>, transform_indices = @transform_2, window_bounds = array<i64: 1, 32>}, {pipeline_mode = #tpu.pipeline_mode<synchronous>, transform_indices = @transform_3, window_bounds = array<i64: 4, 32, 8>}, {pipeline_mode = #tpu.pipeline_mode<synchronous>, transform_indices = @transform_4, window_bounds = array<i64: 4, 32, 8>}, {pipeline_mode = #tpu.pipeline_mode<synchronous>, transform_indices = @transform_5, window_bounds = array<i64: 4, 32, 8>}, {pipeline_mode = #tpu.pipeline_mode<synchronous>, transform_indices = @transform_6, window_bounds = array<i64: 4, 1, 8>}, {pipeline_mode = #tpu.pipeline_mode<synchronous>, transform_indices = @transform_7, window_bounds = array<i64: 4, 1, 8>}, {pipeline_mode = #tpu.pipeline_mode<synchronous>, transform_indices = @transform_8, window_bounds = array<i64: 4, 1, 8>}, {pipeline_mode = #tpu.pipeline_mode<synchronous>, transform_indices = @transform_9, window_bounds = array<i64: 4, 8, 32>}, {pipeline_mode = #tpu.pipeline_mode<synchronous>, transform_indices = @transform_10, window_bounds = array<i64: 1, 32>}, {transform_indices = @transform_11, window_bounds = array<i64: 4, 8, 32>}]} {
    %c0 = arith.constant 0 : index
    %c0_0 = arith.constant 0 : index
    %c0_1 = arith.constant 0 : index
    %0 = vector.load %arg1[%c0, %c0_0, %c0_1] : memref<4x8x32xf32, #tpu.memory_space<vmem>>, vector<4x8x32xf32>
    %1 = vector.shape_cast %0 : vector<4x8x32xf32> to vector<32x32xf32>
    %cst = arith.constant dense<0.000000e+00> : vector<32xf32>
    %2 = vector.multi_reduction <add>, %1, %cst [1] : vector<32x32xf32> to vector<32xf32>
    %3 = vector.shape_cast %2 : vector<32xf32> to vector<32x1xf32>
    %cst_2 = arith.constant 3.200000e+01 : f32
    %4 = vector.broadcast %cst_2 : f32 to vector<32x1xf32>
    %5 = arith.divf %3, %4 : vector<32x1xf32>
    %6 = vector.broadcast %5 : vector<32x1xf32> to vector<32x32xf32>
    %7 = arith.subf %1, %6 : vector<32x32xf32>
    %8 = arith.mulf %7, %7 : vector<32x32xf32>
    %cst_3 = arith.constant dense<0.000000e+00> : vector<32xf32>
    %9 = vector.multi_reduction <add>, %8, %cst_3 [1] : vector<32x32xf32> to vector<32xf32>
    %10 = vector.shape_cast %9 : vector<32xf32> to vector<32x1xf32>
    %cst_4 = arith.constant 3.200000e+01 : f32
    %11 = vector.broadcast %cst_4 : f32 to vector<32x1xf32>
    %12 = arith.divf %10, %11 : vector<32x1xf32>
    %cst_5 = arith.constant 9.99999974E-6 : f32
    %13 = vector.broadcast %cst_5 : f32 to vector<32x1xf32>
    %14 = arith.addf %12, %13 : vector<32x1xf32>
    %15 = math.rsqrt %14 : vector<32x1xf32>
    %16 = vector.broadcast %15 : vector<32x1xf32> to vector<32x32xf32>
    %17 = arith.mulf %7, %16 : vector<32x32xf32>
    %c0_6 = arith.constant 0 : index
    %c0_7 = arith.constant 0 : index
    %18 = vector.load %arg2[%c0_6, %c0_7] : memref<1x32xf32, #tpu.memory_space<vmem>>, vector<1x32xf32>
    %19 = vector.broadcast %18 : vector<1x32xf32> to vector<32x32xf32>
    %20 = arith.mulf %17, %19 : vector<32x32xf32>
    %c0_8 = arith.constant 0 : index
    %c0_9 = arith.constant 0 : index
    %21 = vector.load %arg3[%c0_8, %c0_9] : memref<1x32xf32, #tpu.memory_space<vmem>>, vector<1x32xf32>
    %22 = vector.broadcast %21 : vector<1x32xf32> to vector<32x32xf32>
    %23 = arith.addf %20, %22 : vector<32x32xf32>
    %cst_10 = arith.constant 0.000000e+00 : f32
    %24 = vector.broadcast %cst_10 : f32 to vector<32x32xf32>
    %c0_11 = arith.constant 0 : index
    %c0_12 = arith.constant 0 : index
    %c0_13 = arith.constant 0 : index
    %25 = vector.load %arg4[%c0_11, %c0_12, %c0_13] : memref<4x32x8xf32, #tpu.memory_space<vmem>>, vector<1x32x8xf32>
    %26 = vector.shape_cast %25 : vector<1x32x8xf32> to vector<32x8xf32>
    %cst_14 = arith.constant dense<0.000000e+00> : vector<32x8xf32>
    %27 = tpu.matmul %23, %26, %cst_14 {dimension_numbers = #tpu.dot_dimension_numbers<[1], [0], [0], [1], [0, 0, 1, 1], [], []>} : vector<32x32xf32>, vector<32x8xf32>, vector<32x8xf32> -> vector<32x8xf32>
    %c0_15 = arith.constant 0 : index
    %c0_16 = arith.constant 0 : index
    %c0_17 = arith.constant 0 : index
    %28 = vector.load %arg7[%c0_15, %c0_16, %c0_17] : memref<4x1x8xf32, #tpu.memory_space<vmem>>, vector<1x1x8xf32>
    %29 = vector.shape_cast %28 : vector<1x1x8xf32> to vector<1x8xf32>
    %30 = vector.broadcast %29 : vector<1x8xf32> to vector<32x8xf32>
    %31 = arith.addf %27, %30 : vector<32x8xf32>
    %c0_18 = arith.constant 0 : index
    %c0_19 = arith.constant 0 : index
    %c0_20 = arith.constant 0 : index
    %32 = vector.load %arg5[%c0_18, %c0_19, %c0_20] : memref<4x32x8xf32, #tpu.memory_space<vmem>>, vector<1x32x8xf32>
    %33 = vector.shape_cast %32 : vector<1x32x8xf32> to vector<32x8xf32>
    %cst_21 = arith.constant dense<0.000000e+00> : vector<32x8xf32>
    %34 = tpu.matmul %23, %33, %cst_21 {dimension_numbers = #tpu.dot_dimension_numbers<[1], [0], [0], [1], [0, 0, 1, 1], [], []>} : vector<32x32xf32>, vector<32x8xf32>, vector<32x8xf32> -> vector<32x8xf32>
    %c0_22 = arith.constant 0 : index
    %c0_23 = arith.constant 0 : index
    %c0_24 = arith.constant 0 : index
    %35 = vector.load %arg8[%c0_22, %c0_23, %c0_24] : memref<4x1x8xf32, #tpu.memory_space<vmem>>, vector<1x1x8xf32>
    %36 = vector.shape_cast %35 : vector<1x1x8xf32> to vector<1x8xf32>
    %37 = vector.broadcast %36 : vector<1x8xf32> to vector<32x8xf32>
    %38 = arith.addf %34, %37 : vector<32x8xf32>
    %c0_25 = arith.constant 0 : index
    %c0_26 = arith.constant 0 : index
    %c0_27 = arith.constant 0 : index
    %39 = vector.load %arg6[%c0_25, %c0_26, %c0_27] : memref<4x32x8xf32, #tpu.memory_space<vmem>>, vector<1x32x8xf32>
    %40 = vector.shape_cast %39 : vector<1x32x8xf32> to vector<32x8xf32>
    %cst_28 = arith.constant dense<0.000000e+00> : vector<32x8xf32>
    %41 = tpu.matmul %23, %40, %cst_28 {dimension_numbers = #tpu.dot_dimension_numbers<[1], [0], [0], [1], [0, 0, 1, 1], [], []>} : vector<32x32xf32>, vector<32x8xf32>, vector<32x8xf32> -> vector<32x8xf32>
    %c0_29 = arith.constant 0 : index
    %c0_30 = arith.constant 0 : index
    %c0_31 = arith.constant 0 : index
    %42 = vector.load %arg9[%c0_29, %c0_30, %c0_31] : memref<4x1x8xf32, #tpu.memory_space<vmem>>, vector<1x1x8xf32>
    %43 = vector.shape_cast %42 : vector<1x1x8xf32> to vector<1x8xf32>
    %44 = vector.broadcast %43 : vector<1x8xf32> to vector<32x8xf32>
    %45 = arith.addf %41, %44 : vector<32x8xf32>
    %46 = vector.shape_cast %31 : vector<32x8xf32> to vector<4x8x8xf32>
    %47 = vector.shape_cast %38 : vector<32x8xf32> to vector<4x8x8xf32>
    %48 = vector.shape_cast %45 : vector<32x8xf32> to vector<4x8x8xf32>
    "tpu.trace_start"() <{level = 10 : i32, message = "bqd,bkd->bqk"}> : () -> ()
    %cst_32 = arith.constant dense<0.000000e+00> : vector<4x8x8xf32>
    %49 = tpu.matmul %46, %47, %cst_32 {dimension_numbers = #tpu.dot_dimension_numbers<[2], [2], [1], [1], [0, 0, 0, 1, 1, 1], [0], [0]>} : vector<4x8x8xf32>, vector<4x8x8xf32>, vector<4x8x8xf32> -> vector<4x8x8xf32>
    "tpu.trace_stop"() : () -> ()
    %cst_33 = arith.constant dense<0xFF800000> : vector<4x8xf32>
    %50 = vector.multi_reduction <maximumf>, %49, %cst_33 [2] : vector<4x8x8xf32> to vector<4x8xf32>
    %51 = vector.shape_cast %50 : vector<4x8xf32> to vector<4x8x1xf32>
    %52 = vector.broadcast %51 : vector<4x8x1xf32> to vector<4x8x8xf32>
    %53 = arith.subf %49, %52 : vector<4x8x8xf32>
    %54 = math.exp %53 : vector<4x8x8xf32>
    %cst_34 = arith.constant dense<0.000000e+00> : vector<4x8xf32>
    %55 = vector.multi_reduction <add>, %54, %cst_34 [2] : vector<4x8x8xf32> to vector<4x8xf32>
    %56 = vector.shape_cast %55 : vector<4x8xf32> to vector<4x8x1xf32>
    %57 = vector.broadcast %56 : vector<4x8x1xf32> to vector<4x8x8xf32>
    %58 = arith.divf %54, %57 : vector<4x8x8xf32>
    "tpu.trace_start"() <{level = 10 : i32, message = "bqk,bkd->bqd"}> : () -> ()
    %cst_35 = arith.constant dense<0.000000e+00> : vector<4x8x8xf32>
    %59 = tpu.matmul %58, %48, %cst_35 {dimension_numbers = #tpu.dot_dimension_numbers<[2], [1], [1], [2], [0, 0, 0, 1, 1, 2], [0], [0]>} : vector<4x8x8xf32>, vector<4x8x8xf32>, vector<4x8x8xf32> -> vector<4x8x8xf32>
    "tpu.trace_stop"() : () -> ()
    %60 = vector.shape_cast %59 : vector<4x8x8xf32> to vector<32x8xf32>
    %c0_36 = arith.constant 0 : index
    %c0_37 = arith.constant 0 : index
    %c0_38 = arith.constant 0 : index
    %61 = vector.load %arg10[%c0_36, %c0_37, %c0_38] : memref<4x8x32xf32, #tpu.memory_space<vmem>>, vector<1x8x32xf32>
    %62 = vector.shape_cast %61 : vector<1x8x32xf32> to vector<8x32xf32>
    %cst_39 = arith.constant dense<0.000000e+00> : vector<32x32xf32>
    %63 = tpu.matmul %60, %62, %cst_39 {dimension_numbers = #tpu.dot_dimension_numbers<[1], [0], [0], [1], [0, 0, 1, 1], [], []>} : vector<32x8xf32>, vector<8x32xf32>, vector<32x32xf32> -> vector<32x32xf32>
    %64 = arith.addf %24, %63 : vector<32x32xf32>
    %c1 = arith.constant 1 : index
    %c0_40 = arith.constant 0 : index
    %c0_41 = arith.constant 0 : index
    %65 = vector.load %arg4[%c1, %c0_40, %c0_41] : memref<4x32x8xf32, #tpu.memory_space<vmem>>, vector<1x32x8xf32>
    %66 = vector.shape_cast %65 : vector<1x32x8xf32> to vector<32x8xf32>
    %cst_42 = arith.constant dense<0.000000e+00> : vector<32x8xf32>
    %67 = tpu.matmul %23, %66, %cst_42 {dimension_numbers = #tpu.dot_dimension_numbers<[1], [0], [0], [1], [0, 0, 1, 1], [], []>} : vector<32x32xf32>, vector<32x8xf32>, vector<32x8xf32> -> vector<32x8xf32>
    %c1_43 = arith.constant 1 : index
    %c0_44 = arith.constant 0 : index
    %c0_45 = arith.constant 0 : index
    %68 = vector.load %arg7[%c1_43, %c0_44, %c0_45] : memref<4x1x8xf32, #tpu.memory_space<vmem>>, vector<1x1x8xf32>
    %69 = vector.shape_cast %68 : vector<1x1x8xf32> to vector<1x8xf32>
    %70 = vector.broadcast %69 : vector<1x8xf32> to vector<32x8xf32>
    %71 = arith.addf %67, %70 : vector<32x8xf32>
    %c1_46 = arith.constant 1 : index
    %c0_47 = arith.constant 0 : index
    %c0_48 = arith.constant 0 : index
    %72 = vector.load %arg5[%c1_46, %c0_47, %c0_48] : memref<4x32x8xf32, #tpu.memory_space<vmem>>, vector<1x32x8xf32>
    %73 = vector.shape_cast %72 : vector<1x32x8xf32> to vector<32x8xf32>
    %cst_49 = arith.constant dense<0.000000e+00> : vector<32x8xf32>
    %74 = tpu.matmul %23, %73, %cst_49 {dimension_numbers = #tpu.dot_dimension_numbers<[1], [0], [0], [1], [0, 0, 1, 1], [], []>} : vector<32x32xf32>, vector<32x8xf32>, vector<32x8xf32> -> vector<32x8xf32>
    %c1_50 = arith.constant 1 : index
    %c0_51 = arith.constant 0 : index
    %c0_52 = arith.constant 0 : index
    %75 = vector.load %arg8[%c1_50, %c0_51, %c0_52] : memref<4x1x8xf32, #tpu.memory_space<vmem>>, vector<1x1x8xf32>
    %76 = vector.shape_cast %75 : vector<1x1x8xf32> to vector<1x8xf32>
    %77 = vector.broadcast %76 : vector<1x8xf32> to vector<32x8xf32>
    %78 = arith.addf %74, %77 : vector<32x8xf32>
    %c1_53 = arith.constant 1 : index
    %c0_54 = arith.constant 0 : index
    %c0_55 = arith.constant 0 : index
    %79 = vector.load %arg6[%c1_53, %c0_54, %c0_55] : memref<4x32x8xf32, #tpu.memory_space<vmem>>, vector<1x32x8xf32>
    %80 = vector.shape_cast %79 : vector<1x32x8xf32> to vector<32x8xf32>
    %cst_56 = arith.constant dense<0.000000e+00> : vector<32x8xf32>
    %81 = tpu.matmul %23, %80, %cst_56 {dimension_numbers = #tpu.dot_dimension_numbers<[1], [0], [0], [1], [0, 0, 1, 1], [], []>} : vector<32x32xf32>, vector<32x8xf32>, vector<32x8xf32> -> vector<32x8xf32>
    %c1_57 = arith.constant 1 : index
    %c0_58 = arith.constant 0 : index
    %c0_59 = arith.constant 0 : index
    %82 = vector.load %arg9[%c1_57, %c0_58, %c0_59] : memref<4x1x8xf32, #tpu.memory_space<vmem>>, vector<1x1x8xf32>
    %83 = vector.shape_cast %82 : vector<1x1x8xf32> to vector<1x8xf32>
    %84 = vector.broadcast %83 : vector<1x8xf32> to vector<32x8xf32>
    %85 = arith.addf %81, %84 : vector<32x8xf32>
    %86 = vector.shape_cast %71 : vector<32x8xf32> to vector<4x8x8xf32>
    %87 = vector.shape_cast %78 : vector<32x8xf32> to vector<4x8x8xf32>
    %88 = vector.shape_cast %85 : vector<32x8xf32> to vector<4x8x8xf32>
    "tpu.trace_start"() <{level = 10 : i32, message = "bqd,bkd->bqk"}> : () -> ()
    %cst_60 = arith.constant dense<0.000000e+00> : vector<4x8x8xf32>
    %89 = tpu.matmul %86, %87, %cst_60 {dimension_numbers = #tpu.dot_dimension_numbers<[2], [2], [1], [1], [0, 0, 0, 1, 1, 1], [0], [0]>} : vector<4x8x8xf32>, vector<4x8x8xf32>, vector<4x8x8xf32> -> vector<4x8x8xf32>
    "tpu.trace_stop"() : () -> ()
    %cst_61 = arith.constant dense<0xFF800000> : vector<4x8xf32>
    %90 = vector.multi_reduction <maximumf>, %89, %cst_61 [2] : vector<4x8x8xf32> to vector<4x8xf32>
    %91 = vector.shape_cast %90 : vector<4x8xf32> to vector<4x8x1xf32>
    %92 = vector.broadcast %91 : vector<4x8x1xf32> to vector<4x8x8xf32>
    %93 = arith.subf %89, %92 : vector<4x8x8xf32>
    %94 = math.exp %93 : vector<4x8x8xf32>
    %cst_62 = arith.constant dense<0.000000e+00> : vector<4x8xf32>
    %95 = vector.multi_reduction <add>, %94, %cst_62 [2] : vector<4x8x8xf32> to vector<4x8xf32>
    %96 = vector.shape_cast %95 : vector<4x8xf32> to vector<4x8x1xf32>
    %97 = vector.broadcast %96 : vector<4x8x1xf32> to vector<4x8x8xf32>
    %98 = arith.divf %94, %97 : vector<4x8x8xf32>
    "tpu.trace_start"() <{level = 10 : i32, message = "bqk,bkd->bqd"}> : () -> ()
    %cst_63 = arith.constant dense<0.000000e+00> : vector<4x8x8xf32>
    %99 = tpu.matmul %98, %88, %cst_63 {dimension_numbers = #tpu.dot_dimension_numbers<[2], [1], [1], [2], [0, 0, 0, 1, 1, 2], [0], [0]>} : vector<4x8x8xf32>, vector<4x8x8xf32>, vector<4x8x8xf32> -> vector<4x8x8xf32>
    "tpu.trace_stop"() : () -> ()
    %100 = vector.shape_cast %99 : vector<4x8x8xf32> to vector<32x8xf32>
    %c1_64 = arith.constant 1 : index
    %c0_65 = arith.constant 0 : index
    %c0_66 = arith.constant 0 : index
    %101 = vector.load %arg10[%c1_64, %c0_65, %c0_66] : memref<4x8x32xf32, #tpu.memory_space<vmem>>, vector<1x8x32xf32>
    %102 = vector.shape_cast %101 : vector<1x8x32xf32> to vector<8x32xf32>
    %cst_67 = arith.constant dense<0.000000e+00> : vector<32x32xf32>
    %103 = tpu.matmul %100, %102, %cst_67 {dimension_numbers = #tpu.dot_dimension_numbers<[1], [0], [0], [1], [0, 0, 1, 1], [], []>} : vector<32x8xf32>, vector<8x32xf32>, vector<32x32xf32> -> vector<32x32xf32>
    %104 = arith.addf %64, %103 : vector<32x32xf32>
    %c2 = arith.constant 2 : index
    %c0_68 = arith.constant 0 : index
    %c0_69 = arith.constant 0 : index
    %105 = vector.load %arg4[%c2, %c0_68, %c0_69] : memref<4x32x8xf32, #tpu.memory_space<vmem>>, vector<1x32x8xf32>
    %106 = vector.shape_cast %105 : vector<1x32x8xf32> to vector<32x8xf32>
    %cst_70 = arith.constant dense<0.000000e+00> : vector<32x8xf32>
    %107 = tpu.matmul %23, %106, %cst_70 {dimension_numbers = #tpu.dot_dimension_numbers<[1], [0], [0], [1], [0, 0, 1, 1], [], []>} : vector<32x32xf32>, vector<32x8xf32>, vector<32x8xf32> -> vector<32x8xf32>
    %c2_71 = arith.constant 2 : index
    %c0_72 = arith.constant 0 : index
    %c0_73 = arith.constant 0 : index
    %108 = vector.load %arg7[%c2_71, %c0_72, %c0_73] : memref<4x1x8xf32, #tpu.memory_space<vmem>>, vector<1x1x8xf32>
    %109 = vector.shape_cast %108 : vector<1x1x8xf32> to vector<1x8xf32>
    %110 = vector.broadcast %109 : vector<1x8xf32> to vector<32x8xf32>
    %111 = arith.addf %107, %110 : vector<32x8xf32>
    %c2_74 = arith.constant 2 : index
    %c0_75 = arith.constant 0 : index
    %c0_76 = arith.constant 0 : index
    %112 = vector.load %arg5[%c2_74, %c0_75, %c0_76] : memref<4x32x8xf32, #tpu.memory_space<vmem>>, vector<1x32x8xf32>
    %113 = vector.shape_cast %112 : vector<1x32x8xf32> to vector<32x8xf32>
    %cst_77 = arith.constant dense<0.000000e+00> : vector<32x8xf32>
    %114 = tpu.matmul %23, %113, %cst_77 {dimension_numbers = #tpu.dot_dimension_numbers<[1], [0], [0], [1], [0, 0, 1, 1], [], []>} : vector<32x32xf32>, vector<32x8xf32>, vector<32x8xf32> -> vector<32x8xf32>
    %c2_78 = arith.constant 2 : index
    %c0_79 = arith.constant 0 : index
    %c0_80 = arith.constant 0 : index
    %115 = vector.load %arg8[%c2_78, %c0_79, %c0_80] : memref<4x1x8xf32, #tpu.memory_space<vmem>>, vector<1x1x8xf32>
    %116 = vector.shape_cast %115 : vector<1x1x8xf32> to vector<1x8xf32>
    %117 = vector.broadcast %116 : vector<1x8xf32> to vector<32x8xf32>
    %118 = arith.addf %114, %117 : vector<32x8xf32>
    %c2_81 = arith.constant 2 : index
    %c0_82 = arith.constant 0 : index
    %c0_83 = arith.constant 0 : index
    %119 = vector.load %arg6[%c2_81, %c0_82, %c0_83] : memref<4x32x8xf32, #tpu.memory_space<vmem>>, vector<1x32x8xf32>
    %120 = vector.shape_cast %119 : vector<1x32x8xf32> to vector<32x8xf32>
    %cst_84 = arith.constant dense<0.000000e+00> : vector<32x8xf32>
    %121 = tpu.matmul %23, %120, %cst_84 {dimension_numbers = #tpu.dot_dimension_numbers<[1], [0], [0], [1], [0, 0, 1, 1], [], []>} : vector<32x32xf32>, vector<32x8xf32>, vector<32x8xf32> -> vector<32x8xf32>
    %c2_85 = arith.constant 2 : index
    %c0_86 = arith.constant 0 : index
    %c0_87 = arith.constant 0 : index
    %122 = vector.load %arg9[%c2_85, %c0_86, %c0_87] : memref<4x1x8xf32, #tpu.memory_space<vmem>>, vector<1x1x8xf32>
    %123 = vector.shape_cast %122 : vector<1x1x8xf32> to vector<1x8xf32>
    %124 = vector.broadcast %123 : vector<1x8xf32> to vector<32x8xf32>
    %125 = arith.addf %121, %124 : vector<32x8xf32>
    %126 = vector.shape_cast %111 : vector<32x8xf32> to vector<4x8x8xf32>
    %127 = vector.shape_cast %118 : vector<32x8xf32> to vector<4x8x8xf32>
    %128 = vector.shape_cast %125 : vector<32x8xf32> to vector<4x8x8xf32>
    "tpu.trace_start"() <{level = 10 : i32, message = "bqd,bkd->bqk"}> : () -> ()
    %cst_88 = arith.constant dense<0.000000e+00> : vector<4x8x8xf32>
    %129 = tpu.matmul %126, %127, %cst_88 {dimension_numbers = #tpu.dot_dimension_numbers<[2], [2], [1], [1], [0, 0, 0, 1, 1, 1], [0], [0]>} : vector<4x8x8xf32>, vector<4x8x8xf32>, vector<4x8x8xf32> -> vector<4x8x8xf32>
    "tpu.trace_stop"() : () -> ()
    %cst_89 = arith.constant dense<0xFF800000> : vector<4x8xf32>
    %130 = vector.multi_reduction <maximumf>, %129, %cst_89 [2] : vector<4x8x8xf32> to vector<4x8xf32>
    %131 = vector.shape_cast %130 : vector<4x8xf32> to vector<4x8x1xf32>
    %132 = vector.broadcast %131 : vector<4x8x1xf32> to vector<4x8x8xf32>
    %133 = arith.subf %129, %132 : vector<4x8x8xf32>
    %134 = math.exp %133 : vector<4x8x8xf32>
    %cst_90 = arith.constant dense<0.000000e+00> : vector<4x8xf32>
    %135 = vector.multi_reduction <add>, %134, %cst_90 [2] : vector<4x8x8xf32> to vector<4x8xf32>
    %136 = vector.shape_cast %135 : vector<4x8xf32> to vector<4x8x1xf32>
    %137 = vector.broadcast %136 : vector<4x8x1xf32> to vector<4x8x8xf32>
    %138 = arith.divf %134, %137 : vector<4x8x8xf32>
    "tpu.trace_start"() <{level = 10 : i32, message = "bqk,bkd->bqd"}> : () -> ()
    %cst_91 = arith.constant dense<0.000000e+00> : vector<4x8x8xf32>
    %139 = tpu.matmul %138, %128, %cst_91 {dimension_numbers = #tpu.dot_dimension_numbers<[2], [1], [1], [2], [0, 0, 0, 1, 1, 2], [0], [0]>} : vector<4x8x8xf32>, vector<4x8x8xf32>, vector<4x8x8xf32> -> vector<4x8x8xf32>
    "tpu.trace_stop"() : () -> ()
    %140 = vector.shape_cast %139 : vector<4x8x8xf32> to vector<32x8xf32>
    %c2_92 = arith.constant 2 : index
    %c0_93 = arith.constant 0 : index
    %c0_94 = arith.constant 0 : index
    %141 = vector.load %arg10[%c2_92, %c0_93, %c0_94] : memref<4x8x32xf32, #tpu.memory_space<vmem>>, vector<1x8x32xf32>
    %142 = vector.shape_cast %141 : vector<1x8x32xf32> to vector<8x32xf32>
    %cst_95 = arith.constant dense<0.000000e+00> : vector<32x32xf32>
    %143 = tpu.matmul %140, %142, %cst_95 {dimension_numbers = #tpu.dot_dimension_numbers<[1], [0], [0], [1], [0, 0, 1, 1], [], []>} : vector<32x8xf32>, vector<8x32xf32>, vector<32x32xf32> -> vector<32x32xf32>
    %144 = arith.addf %104, %143 : vector<32x32xf32>
    %c3 = arith.constant 3 : index
    %c0_96 = arith.constant 0 : index
    %c0_97 = arith.constant 0 : index
    %145 = vector.load %arg4[%c3, %c0_96, %c0_97] : memref<4x32x8xf32, #tpu.memory_space<vmem>>, vector<1x32x8xf32>
    %146 = vector.shape_cast %145 : vector<1x32x8xf32> to vector<32x8xf32>
    %cst_98 = arith.constant dense<0.000000e+00> : vector<32x8xf32>
    %147 = tpu.matmul %23, %146, %cst_98 {dimension_numbers = #tpu.dot_dimension_numbers<[1], [0], [0], [1], [0, 0, 1, 1], [], []>} : vector<32x32xf32>, vector<32x8xf32>, vector<32x8xf32> -> vector<32x8xf32>
    %c3_99 = arith.constant 3 : index
    %c0_100 = arith.constant 0 : index
    %c0_101 = arith.constant 0 : index
    %148 = vector.load %arg7[%c3_99, %c0_100, %c0_101] : memref<4x1x8xf32, #tpu.memory_space<vmem>>, vector<1x1x8xf32>
    %149 = vector.shape_cast %148 : vector<1x1x8xf32> to vector<1x8xf32>
    %150 = vector.broadcast %149 : vector<1x8xf32> to vector<32x8xf32>
    %151 = arith.addf %147, %150 : vector<32x8xf32>
    %c3_102 = arith.constant 3 : index
    %c0_103 = arith.constant 0 : index
    %c0_104 = arith.constant 0 : index
    %152 = vector.load %arg5[%c3_102, %c0_103, %c0_104] : memref<4x32x8xf32, #tpu.memory_space<vmem>>, vector<1x32x8xf32>
    %153 = vector.shape_cast %152 : vector<1x32x8xf32> to vector<32x8xf32>
    %cst_105 = arith.constant dense<0.000000e+00> : vector<32x8xf32>
    %154 = tpu.matmul %23, %153, %cst_105 {dimension_numbers = #tpu.dot_dimension_numbers<[1], [0], [0], [1], [0, 0, 1, 1], [], []>} : vector<32x32xf32>, vector<32x8xf32>, vector<32x8xf32> -> vector<32x8xf32>
    %c3_106 = arith.constant 3 : index
    %c0_107 = arith.constant 0 : index
    %c0_108 = arith.constant 0 : index
    %155 = vector.load %arg8[%c3_106, %c0_107, %c0_108] : memref<4x1x8xf32, #tpu.memory_space<vmem>>, vector<1x1x8xf32>
    %156 = vector.shape_cast %155 : vector<1x1x8xf32> to vector<1x8xf32>
    %157 = vector.broadcast %156 : vector<1x8xf32> to vector<32x8xf32>
    %158 = arith.addf %154, %157 : vector<32x8xf32>
    %c3_109 = arith.constant 3 : index
    %c0_110 = arith.constant 0 : index
    %c0_111 = arith.constant 0 : index
    %159 = vector.load %arg6[%c3_109, %c0_110, %c0_111] : memref<4x32x8xf32, #tpu.memory_space<vmem>>, vector<1x32x8xf32>
    %160 = vector.shape_cast %159 : vector<1x32x8xf32> to vector<32x8xf32>
    %cst_112 = arith.constant dense<0.000000e+00> : vector<32x8xf32>
    %161 = tpu.matmul %23, %160, %cst_112 {dimension_numbers = #tpu.dot_dimension_numbers<[1], [0], [0], [1], [0, 0, 1, 1], [], []>} : vector<32x32xf32>, vector<32x8xf32>, vector<32x8xf32> -> vector<32x8xf32>
    %c3_113 = arith.constant 3 : index
    %c0_114 = arith.constant 0 : index
    %c0_115 = arith.constant 0 : index
    %162 = vector.load %arg9[%c3_113, %c0_114, %c0_115] : memref<4x1x8xf32, #tpu.memory_space<vmem>>, vector<1x1x8xf32>
    %163 = vector.shape_cast %162 : vector<1x1x8xf32> to vector<1x8xf32>
    %164 = vector.broadcast %163 : vector<1x8xf32> to vector<32x8xf32>
    %165 = arith.addf %161, %164 : vector<32x8xf32>
    %166 = vector.shape_cast %151 : vector<32x8xf32> to vector<4x8x8xf32>
    %167 = vector.shape_cast %158 : vector<32x8xf32> to vector<4x8x8xf32>
    %168 = vector.shape_cast %165 : vector<32x8xf32> to vector<4x8x8xf32>
    "tpu.trace_start"() <{level = 10 : i32, message = "bqd,bkd->bqk"}> : () -> ()
    %cst_116 = arith.constant dense<0.000000e+00> : vector<4x8x8xf32>
    %169 = tpu.matmul %166, %167, %cst_116 {dimension_numbers = #tpu.dot_dimension_numbers<[2], [2], [1], [1], [0, 0, 0, 1, 1, 1], [0], [0]>} : vector<4x8x8xf32>, vector<4x8x8xf32>, vector<4x8x8xf32> -> vector<4x8x8xf32>
    "tpu.trace_stop"() : () -> ()
    %cst_117 = arith.constant dense<0xFF800000> : vector<4x8xf32>
    %170 = vector.multi_reduction <maximumf>, %169, %cst_117 [2] : vector<4x8x8xf32> to vector<4x8xf32>
    %171 = vector.shape_cast %170 : vector<4x8xf32> to vector<4x8x1xf32>
    %172 = vector.broadcast %171 : vector<4x8x1xf32> to vector<4x8x8xf32>
    %173 = arith.subf %169, %172 : vector<4x8x8xf32>
    %174 = math.exp %173 : vector<4x8x8xf32>
    %cst_118 = arith.constant dense<0.000000e+00> : vector<4x8xf32>
    %175 = vector.multi_reduction <add>, %174, %cst_118 [2] : vector<4x8x8xf32> to vector<4x8xf32>
    %176 = vector.shape_cast %175 : vector<4x8xf32> to vector<4x8x1xf32>
    %177 = vector.broadcast %176 : vector<4x8x1xf32> to vector<4x8x8xf32>
    %178 = arith.divf %174, %177 : vector<4x8x8xf32>
    "tpu.trace_start"() <{level = 10 : i32, message = "bqk,bkd->bqd"}> : () -> ()
    %cst_119 = arith.constant dense<0.000000e+00> : vector<4x8x8xf32>
    %179 = tpu.matmul %178, %168, %cst_119 {dimension_numbers = #tpu.dot_dimension_numbers<[2], [1], [1], [2], [0, 0, 0, 1, 1, 2], [0], [0]>} : vector<4x8x8xf32>, vector<4x8x8xf32>, vector<4x8x8xf32> -> vector<4x8x8xf32>
    "tpu.trace_stop"() : () -> ()
    %180 = vector.shape_cast %179 : vector<4x8x8xf32> to vector<32x8xf32>
    %c3_120 = arith.constant 3 : index
    %c0_121 = arith.constant 0 : index
    %c0_122 = arith.constant 0 : index
    %181 = vector.load %arg10[%c3_120, %c0_121, %c0_122] : memref<4x8x32xf32, #tpu.memory_space<vmem>>, vector<1x8x32xf32>
    %182 = vector.shape_cast %181 : vector<1x8x32xf32> to vector<8x32xf32>
    %cst_123 = arith.constant dense<0.000000e+00> : vector<32x32xf32>
    %183 = tpu.matmul %180, %182, %cst_123 {dimension_numbers = #tpu.dot_dimension_numbers<[1], [0], [0], [1], [0, 0, 1, 1], [], []>} : vector<32x8xf32>, vector<8x32xf32>, vector<32x32xf32> -> vector<32x32xf32>
    %184 = arith.addf %144, %183 : vector<32x32xf32>
    %c0_124 = arith.constant 0 : index
    %c0_125 = arith.constant 0 : index
    %185 = vector.load %arg11[%c0_124, %c0_125] : memref<1x32xf32, #tpu.memory_space<vmem>>, vector<1x32xf32>
    %186 = vector.broadcast %185 : vector<1x32xf32> to vector<32x32xf32>
    %187 = arith.addf %184, %186 : vector<32x32xf32>
    %188 = vector.shape_cast %187 : vector<32x32xf32> to vector<4x8x32xf32>
    %c0_126 = arith.constant 0 : index
    %c0_127 = arith.constant 0 : index
    %c0_128 = arith.constant 0 : index
    %189 = vector.load %arg12[%c0_126, %c0_127, %c0_128] : memref<4x8x32xf32, #tpu.memory_space<vmem>>, vector<4x8x32xf32>
    tpu.vector_store %arg12[%c0_126, %c0_127, %c0_128], %188 {strides = array<i32>} : memref<4x8x32xf32, #tpu.memory_space<vmem>>, vector<4x8x32xf32>,
    return
  }
  func.func @transform_0(%arg0: i32) -> (i32, i32, i32) {
    %c0_i32 = arith.constant 0 : i32
    %c0_i32_0 = arith.constant 0 : i32
    %c0_i32_1 = arith.constant 0 : i32
    return %arg0, %c0_i32, %c0_i32_0 : i32, i32, i32
  }
  func.func @transform_1(%arg0: i32) -> (i32, i32) {
    %c0_i32 = arith.constant 0 : i32
    %c0_i32_0 = arith.constant 0 : i32
    %c0_i32_1 = arith.constant 0 : i32
    return %c0_i32, %c0_i32_0 : i32, i32
  }
  func.func @transform_2(%arg0: i32) -> (i32, i32) {
    %c0_i32 = arith.constant 0 : i32
    %c0_i32_0 = arith.constant 0 : i32
    %c0_i32_1 = arith.constant 0 : i32
    return %c0_i32, %c0_i32_0 : i32, i32
  }
  func.func @transform_3(%arg0: i32) -> (i32, i32, i32) {
    %c0_i32 = arith.constant 0 : i32
    %c0_i32_0 = arith.constant 0 : i32
    %c0_i32_1 = arith.constant 0 : i32
    %c0_i32_2 = arith.constant 0 : i32
    return %c0_i32, %c0_i32_0, %c0_i32_1 : i32, i32, i32
  }
  func.func @transform_4(%arg0: i32) -> (i32, i32, i32) {
    %c0_i32 = arith.constant 0 : i32
    %c0_i32_0 = arith.constant 0 : i32
    %c0_i32_1 = arith.constant 0 : i32
    %c0_i32_2 = arith.constant 0 : i32
    return %c0_i32, %c0_i32_0, %c0_i32_1 : i32, i32, i32
  }
  func.func @transform_5(%arg0: i32) -> (i32, i32, i32) {
    %c0_i32 = arith.constant 0 : i32
    %c0_i32_0 = arith.constant 0 : i32
    %c0_i32_1 = arith.constant 0 : i32
    %c0_i32_2 = arith.constant 0 : i32
    return %c0_i32, %c0_i32_0, %c0_i32_1 : i32, i32, i32
  }
  func.func @transform_6(%arg0: i32) -> (i32, i32, i32) {
    %c0_i32 = arith.constant 0 : i32
    %c0_i32_0 = arith.constant 0 : i32
    %c0_i32_1 = arith.constant 0 : i32
    %c0_i32_2 = arith.constant 0 : i32
    return %c0_i32, %c0_i32_0, %c0_i32_1 : i32, i32, i32
  }
  func.func @transform_7(%arg0: i32) -> (i32, i32, i32) {
    %c0_i32 = arith.constant 0 : i32
    %c0_i32_0 = arith.constant 0 : i32
    %c0_i32_1 = arith.constant 0 : i32
    %c0_i32_2 = arith.constant 0 : i32
    return %c0_i32, %c0_i32_0, %c0_i32_1 : i32, i32, i32
  }
  func.func @transform_8(%arg0: i32) -> (i32, i32, i32) {
    %c0_i32 = arith.constant 0 : i32
    %c0_i32_0 = arith.constant 0 : i32
    %c0_i32_1 = arith.constant 0 : i32
    %c0_i32_2 = arith.constant 0 : i32
    return %c0_i32, %c0_i32_0, %c0_i32_1 : i32, i32, i32
  }
  func.func @transform_9(%arg0: i32) -> (i32, i32, i32) {
    %c0_i32 = arith.constant 0 : i32
    %c0_i32_0 = arith.constant 0 : i32
    %c0_i32_1 = arith.constant 0 : i32
    %c0_i32_2 = arith.constant 0 : i32
    return %c0_i32, %c0_i32_0, %c0_i32_1 : i32, i32, i32
  }
  func.func @transform_10(%arg0: i32) -> (i32, i32) {
    %c0_i32 = arith.constant 0 : i32
    %c0_i32_0 = arith.constant 0 : i32
    %c0_i32_1 = arith.constant 0 : i32
    return %c0_i32, %c0_i32_0 : i32, i32
  }
  func.func @transform_11(%arg0: i32) -> (i32, i32, i32) {
    %c0_i32 = arith.constant 0 : i32
    %c0_i32_0 = arith.constant 0 : i32
    %c0_i32_1 = arith.constant 0 : i32
    return %arg0, %c0_i32, %c0_i32_0 : i32, i32, i32
  }
}

</mosaic_0001>

<bundles_post_ra>
// kernel: tpu_custom_call.1
= control target key start
LH: loop header
LB: loop body
LE: loop exit
PB: predicated region body
PF: predicated region fallthrough
CT: control target
= control target key end

     0   :  { %s3488_s0 = inlined_call_operand.vmem [shape: f32[8,8,32], index: 0, kind: input, shape index: {}]   ;;  %s3489_s1 = inlined_call_operand.vmem [shape: f32[1,32], index: 1, kind: input, shape index: {}]   ;;  %s3490_s2 = inlined_call_operand.vmem [shape: f32[1,32], index: 2, kind: input, shape index: {}]   ;;  %s3491_s3 = inlined_call_operand.vmem [shape: f32[4,32,8], index: 3, kind: input, shape index: {}]   ;;  %s3492_s4 = inlined_call_operand.vmem [shape: f32[4,32,8], index: 4, kind: input, shape index: {}]   ;;  %s3493_s5 = inlined_call_operand.vmem [shape: f32[4,32,8], index: 5, kind: input, shape index: {}]   ;;  %s3494_s6 = inlined_call_operand.vmem [shape: f32[4,1,8], index: 6, kind: input, shape index: {}]   ;;  %s3495_s7 = inlined_call_operand.vmem [shape: f32[4,1,8], index: 7, kind: input, shape index: {}]   ;;  %s3496_s8 = inlined_call_operand.vmem [shape: f32[4,1,8], index: 8, kind: input, shape index: {}]   ;;  %s3497_s9 = inlined_call_operand.vmem [shape: f32[4,8,32], index: 9, kind: input, shape index: {}]   ;;  %s3498_s10 = inlined_call_operand.vmem [shape: f32[1,32], index: 10, kind: input, shape index: {}]   ;;  %s3499_s11 = inlined_call_operand.hbm [shape: f32[8,8,32], index: 11, kind: output, shape index: {}]  }
   0x1   :  { %3500 = sst [smem:[#allocation5_spill]] %s3488_s0 }
   0x2   :  { %16 = vsyncpa [#allocation3], 0 }
   0x3   :  { %18 = vsyncpa [#allocation3 + $0x1], 0  ;;  %s2855_s17 = smov 0   ;;  %s2857_s18 = smov 0  }
   0x4   :  { %s2859_s19 = smov 0   ;;  %s2861_s20 = smov 0  }
   0x5 LB: > { %s2876_s21 = sadd.s32 4294967295, %s2790_s20   ;;  %s2416_s22 = sadd.s32 4294967294, %s2790_s20   ;;  %s2790_s20 = sphi %s2861_s20, %s3507_s20   ;;  %s2786_s19 = sphi %s2859_s19, %s3506_s19   ;;  %s2782_s18 = sphi %s2857_s18, %s3505_s18   ;;  %s2778_s17 = sphi %s2855_s17, %s3504_s17  }
   0x6   : > { %s2880_s23 = sadd.s32 1, %s2790_s20   ;;  %s267_s24 = sadd.s32 1, %s2786_s19 }
   0x7   : > { %s264_s25 = ssub.s32 %s2790_s20, %s2880_s23  ;;  %p277_p0 = scmp.ne.s32.totalorder %s2786_s19, %s2782_s18 }
   0x8   : > { %p265_p1 = scmp.eq.s32.totalorder %s264_s25, 0  ;;  %p278_p2 = scmp.eq.s32.totalorder %s2876_s21, 1 }
   0x9   : > { %p283_p3 = scmp.ne.s32.totalorder %s2782_s18, %s2778_s17  ;;  %p284_p4 = scmp.eq.s32.totalorder %s2416_s22, 1 }
   0xa   : > { %s2891_s26 = scalar_select %p265_p1, %s2786_s19, %s267_s24  }
   0xb   : > { %p2893_p5 = por %p278_p2, %p277_p0  ;;  %p2897_p6 = por %p284_p4, %p283_p3 }
   0xc   : > { %p2419_p7 = scmp.ge.s32.totalorder %s2790_s20, 1  ;;  %p341_p8 = scmp.lt.s32.totalorder %s2790_s20, 3 }
   0xe   : > { %p342_p9 = pnand %p2419_p7, %p341_p8 }
   0xf   : > { %s2421_s29 = sshll.u32 (!%p342_p9), %s2876_s21, 2  ;;  %s3503_s0 = sld [smem:[#allocation5_spill]] (!%p342_p9) }
  0x10   : > { %345 = sbr.rel (%p342_p9) target bundleno = 2828 (0xb0c), region = 64  ;;  %p382_p10 = scmp.lt.s32.totalorder (!%p342_p9), %s2421_s29, 7 }
  0x11   : > { %s378_s22 = sand.u32 (!%p342_p9), 1, %s2782_s18   ;;  %s2588_s12 = sshll.u32 (!%p342_p9), %s2876_s21, 5 }
  0x12   : > { %s2420_s24 = sshll.u32 (!%p342_p9), %s378_s22, 5  ;;  %s2350_s15 = scalar_lea.hbm (!%p342_p9), %s3499_s11, %s2588_s12 }
  0x13   : > { %s2339_s25 = scalar_lea.sflag (!%p342_p9), [#allocation3], %s378_s22 }
  0x15   : > { %s3509_s29 = smov (!%p382_p10, %s2421_s29), 7  ;;  %vm392_vm0 = vcmask 261120   ;;  %v2792_v8 = vmov 32.0   ;;  %v507_v35 = vld [vmem:[%s3491_s3 + $0x18] sm:$0xff]  ;;  %v506_v36 = vld [vmem:[%s3491_s3 + $0x10] sm:$0xff]  ;;  %v505_v37 = vld [vmem:[%s3491_s3 + $0x8] sm:$0xff] }
  0x16   : > { %s2422_s30 = sshll.u32 %s3509_s29, 3  ;;  %2654 = vrcp.f32 %v2792_v8  ;;  %2589 = vmatpush.msra.mxu1 %v507_v35  ;;  %536 = vmatpush.msra.mxu0 %v507_v35  ;;  %v504_v38 = vld [vmem:[%s3491_s3] sm:$0xff]  ;;  %v556_v39 = vld [vmem:[%s3492_s4 + $0x18] sm:$0xff]  ;;  %v555_v42 = vld [vmem:[%s3492_s4 + $0x10] sm:$0xff]  ;;  %vm627_vm14 = vcmask 64512  }
  0x17   : > { %s385_s14 = scalar_lea.vmem %s3503_s0, %s2422_s30  ;;  %v593_v40 = vld [vmem:[%s3493_s5 + $0x18] sm:$0xff]  ;;  %v592_v43 = vld [vmem:[%s3493_s5 + $0x10] sm:$0xff]  ;;  %v554_v45 = vld [vmem:[%s3492_s4 + $0x8] sm:$0xff]  ;;  %s380_s30 = scalar_lea.vmem [#allocation2], %s2420_s24 }
  0x18   : > { %v391_v0 = vld [vmem:[%s385_s14 + $0x18] sm:$0xff]  ;;  %v389_v1 = vld [vmem:[%s385_s14 + $0x8] sm:$0xff]  ;;  %v388_v4 = vld [vmem:[%s385_s14] sm:$0xff]  ;;  %2590 = vmatpush.msra.mxu1 %v506_v36  ;;  %537 = vmatpush.msra.mxu0 %v506_v36  ;;  %s2351_s16 = sshll.u32 %s380_s30, 4  ;;  %s2353_s24 = sshll.u32 %s2350_s15, 4  ;;  %s2352_s16 = int_to_ptr.vmem [resolvable:$true] %s2351_s16  ;;  %s2354_s24 = int_to_ptr.hbm [resolvable:$true] %s2353_s24 }
  0x19   : > { %v402_v2 = vsel %vm392_vm0, %v391_v0, 0.0  ;;  %v396_v3 = vsel %vm392_vm0, %v389_v1, 0.0  ;;  %v393_v5 = vsel %vm392_vm0, %v388_v4, 0.0  ;;  %v390_v6 = vld [vmem:[%s385_s14 + $0x10] sm:$0xff]  ;;  %610 = vmatpush.msra.mxu2 %v593_v40  ;;  %v591_v46 = vld [vmem:[%s3493_s5 + $0x8] sm:$0xff]  ;;  %v553_v48 = vld [vmem:[%s3492_s4] sm:$0xff] }
  0x1a   : > { %403 = vadd.xlane.f32.xlu0 %v402_v2  ;;  %397 = vadd.xlane.f32.xlu1 %v396_v3  ;;  %v399_v7 = vsel %vm392_vm0, %v390_v6, 0.0  ;;  %v590_v49 = vld [vmem:[%s3493_s5] sm:$0xff]  ;;  %s2742_s21 = sshra.s32 %s2354_s24, 4  ;;  %s2748_s14 = scalar_lea.hbm %s3499_s11, 64  ;;  %s2743_s21 = int_to_ptr.hbm [resolvable:$true] %s2742_s21 }
  0x1b   : > { %2591 = vmatpush.msra.mxu1 %v505_v37  ;;  %538 = vmatpush.msra.mxu0 %v505_v37  ;;  %v2639_v3 = vld [vmem:[%s3489_s1] ss:$0 sm:$0xff]  ;;  %s2744_s29 = scalar_lea.hbm %s2743_s21, 32  ;;  %p2749_p0 = scmp.lt.s32.totalorder %s2743_s21, %s3499_s11 }
  0x1c   : > { %v2655_v9 = vpop.eup %2654  ;;  %611 = vmatpush.msra.mxu2 %v592_v43  ;;  %p2745_p11 = scmp.ne.s32.totalorder %s2743_s21, %s2744_s29  ;;  %p2750_p1 = scmp.lt.s32.totalorder %s2748_s14, %s2744_s29 }
  0x1d   : > { %v406_v10 = vmul.f32 32.0, %v2655_v9  ;;  %vm410_vm1 = vweird.f32 %v2655_v9  ;;  %2592 = vmatpush.msra.mxu1 %v504_v38  ;;  %539 = vmatpush.msra.mxu0 %v504_v38 }
  0x1e   : > { %612 = vmatpush.msra.mxu2 %v591_v46  ;;  %p2746_p12 = pnand %p2745_p11, %p2893_p5  ;;  %p2751_p2 = por %p2750_p1, %p2749_p0 }
  0x1f   : > { %v407_v11 = vsub.f32 1.0, %v406_v10  ;;  %573 = vmatpush.msrb.mxu1 %v556_v39 }
  0x20   : > { %613 = vmatpush.msra.mxu2 %v590_v49  ;;  %v2643_v49 = vld [vmem:[%s3496_s8] ss:$0 sm:$0xff]  ;;  %p2747_p13 = pneg %p2746_p12 }
  0x21   : > { %v408_v12 = vmul.f32 %v2655_v9, %v407_v11  ;;  %574 = vmatpush.msrb.mxu1 %v555_v42  ;;  %v2641_v42 = vld [vmem:[%s3494_s6] ss:$0 sm:$0xff] }
  0x22   : > { %394 = vadd.xlane.f32.xlu0 %v393_v5  ;;  %p2752_p3 = pnand %p2751_p2, %p2747_p13 }
  0x23   : > { %v409_v13 = vadd.f32 %v2655_v9, %v408_v12  ;;  %575 = vmatpush.msrb.mxu1 %v554_v45 }
  0x25   : > { %v2911_v14 = vsel %vm410_vm1, %v2655_v9, %v409_v13  ;;  %576 = vmatpush.msrb.mxu1 %v553_v48 }
  0x2a   : > { %400 = vadd.xlane.f32.xlu0 %v399_v7 }
  0x8d   : > { %v404_v15 = vpop.xlane.xlu0 %403  ;;  %v398_v19 = vpop.xlane.xlu1 %397 }
  0x8e   : > { %v415_v16 = vmul.f32 %v2911_v14, %v404_v15  ;;  %v413_v23 = vmul.f32 %v2911_v14, %v398_v19 }
  0x90   : > { %v2914_v17 = vsub.f32 %v391_v0, %v415_v16  ;;  %v2923_v25 = vsub.f32 %v389_v1, %v413_v23 }
  0x92   : > { %v423_v18 = vmul.f32 %v2914_v17, %v2914_v17  ;;  %v421_v30 = vmul.f32 %v2923_v25, %v2923_v25 }
  0x94   : > { %v433_v20 = vsel %vm392_vm0, %v423_v18, 0.0  ;;  %v427_v32 = vsel %vm392_vm0, %v421_v30, 0.0 }
  0x95   : > { %434 = vadd.xlane.f32.xlu1 %v433_v20  ;;  %v395_v21 = vpop.xlane.xlu0 %394 }
  0x96   : > { %v412_v22 = vmul.f32 %v2911_v14, %v395_v21 }
  0x98   : > { %v2921_v24 = vsub.f32 %v388_v4, %v412_v22 }
  0x9a   : > { %v420_v26 = vmul.f32 %v2921_v24, %v2921_v24 }
  0x9c   : > { %v424_v27 = vsel %vm392_vm0, %v420_v26, 0.0 }
  0x9d   : > { %425 = vadd.xlane.f32.xlu2 %v424_v27  ;;  %v401_v28 = vpop.xlane.xlu0 %400 }
  0x9e   : > { %v414_v29 = vmul.f32 %v2911_v14, %v401_v28 }
  0xa0   : > { %v2931_v31 = vsub.f32 %v390_v6, %v414_v29  ;;  %v2640_v6 = vld [vmem:[%s3490_s2] ss:$0 sm:$0xff] }
  0xa2   : > { %v422_v33 = vmul.f32 %v2931_v31, %v2931_v31 }
  0xa4   : > { %v430_v34 = vsel %vm392_vm0, %v422_v33, 0.0 }
  0xa5   : > { %428 = vadd.xlane.f32.xlu2 %v427_v32  ;;  %431 = vadd.xlane.f32.xlu1 %v430_v34 }
 0x108   : > { %v435_v41 = vpop.xlane.xlu1 %434 }
 0x109   : > { %v439_v44 = vmul.f32 %v435_v41, %v2911_v14 }
 0x10b   : > { %v443_v47 = vadd.f32 1e-05, %v439_v44 }
 0x10d   : > { %2656 = vrsqrt.f32 %v443_v47  ;;  %vm480_vm3 = vweird.f32 %v443_v47 }
 0x110   : > { %v426_v50 = vpop.xlane.xlu2 %425 }
 0x111   : > { %v436_v51 = vmul.f32 %v426_v50, %v2911_v14 }
 0x113   : > { %v2657_v52 = vpop.eup %2656  ;;  %v440_v53 = vadd.f32 1e-05, %v436_v51 }
 0x114   : > { %v475_v54 = vmul.f32 %v2657_v52, %v443_v47  ;;  %vm481_vm2 = vweird.f32 %v2657_v52 }
 0x115   : > { %2658 = vrsqrt.f32 %v440_v53  ;;  %vm482_vm4 = vmor %vm480_vm3, %vm481_vm2  ;;  %vm450_vm6 = vweird.f32 %v440_v53 }
 0x116   : > { %v476_v55 = vmul.f32 %v2657_v52, %v475_v54 }
 0x118   : > { %v477_v56 = vmul.f32 0.5, %v476_v55  ;;  %v429_v57 = vpop.xlane.xlu2 %428  ;;  %v432_v58 = vpop.xlane.xlu1 %431 }
 0x119   : > { %v437_v59 = vmul.f32 %v429_v57, %v2911_v14  ;;  %v438_v60 = vmul.f32 %v432_v58, %v2911_v14 }
 0x11a   : > { %v478_v61 = vsub.f32 1.5, %v477_v56 }
 0x11b   : > { %v2659_v62 = vpop.eup %2658  ;;  %v441_v63 = vadd.f32 1e-05, %v437_v59  ;;  %v442_v0 = vadd.f32 1e-05, %v438_v60 }
 0x11c   : > { %v479_v1 = vmul.f32 %v2657_v52, %v478_v61  ;;  %v445_v2 = vmul.f32 %v2659_v62, %v440_v53  ;;  %vm451_vm5 = vweird.f32 %v2659_v62 }
 0x11d   : > { %2660 = vrsqrt.f32 %v441_v63  ;;  %vm452_vm7 = vmor %vm450_vm6, %vm451_vm5  ;;  %vm470_vm9 = vweird.f32 %v442_v0  ;;  %vm460_vm11 = vweird.f32 %v441_v63 }
 0x11e   : > { %v483_v4 = vsel %vm482_vm4, %v2657_v52, %v479_v1  ;;  %v446_v5 = vmul.f32 %v2659_v62, %v445_v2  ;;  %2662 = vrsqrt.f32 %v442_v0 }
 0x11f   : > { %v487_v7 = vmul.f32 %v483_v4, %v2914_v17 }
 0x120   : > { %v447_v8 = vmul.f32 0.5, %v446_v5 }
 0x121   : > { %v495_v9 = vmul.f32 %v2639_v3, %v487_v7 }
 0x122   : > { %v448_v10 = vsub.f32 1.5, %v447_v8 }
 0x123   : > { %v2661_v11 = vpop.eup %2660  ;;  %v2984_v12 = vadd.f32 %v2640_v6, %v495_v9 }
 0x124   : > { %v2663_v13 = vpop.eup %2662  ;;  %v449_v14 = vmul.f32 %v2659_v62, %v448_v10  ;;  %v455_v15 = vmul.f32 %v2661_v11, %v441_v63  ;;  %vm461_vm8 = vweird.f32 %v2661_v11 }
 0x125   : > { %v465_v16 = vmul.f32 %v2663_v13, %v442_v0  ;;  %2426 = vmatmul.msk.f32.vlgmr.msra.gmra.mxu1 %vm392_vm0, %v2984_v12  ;;  %vm471_vm10 = vweird.f32 %v2663_v13  ;;  %vm462_vm12 = vmor %vm460_vm11, %vm461_vm8 }
 0x126   : > { %v453_v18 = vsel %vm452_vm7, %v2659_v62, %v449_v14  ;;  %v456_v19 = vmul.f32 %v2661_v11, %v455_v15  ;;  %vm472_vm13 = vmor %vm470_vm9, %vm471_vm10 }
 0x127   : > { %v484_v17 = vmul.f32 %v453_v18, %v2921_v24  ;;  %v466_v20 = vmul.f32 %v2663_v13, %v465_v16 }
 0x128   : > { %v457_v21 = vmul.f32 0.5, %v456_v19 }
 0x129   : > { %v492_v22 = vmul.f32 %v2639_v3, %v484_v17  ;;  %v467_v23 = vmul.f32 0.5, %v466_v20 }
 0x12a   : > { %v458_v26 = vsub.f32 1.5, %v457_v21 }
 0x12b   : > { %v2989_v27 = vadd.f32 %v2640_v6, %v492_v22  ;;  %v468_v28 = vsub.f32 1.5, %v467_v23 }
 0x12c   : > { %v459_v29 = vmul.f32 %v2661_v11, %v458_v26  ;;  %v2450_v26 = vld [vmem:[%s3491_s3 + $0x38] sm:$0xff] }
 0x12d   : > { %v469_v30 = vmul.f32 %v2663_v13, %v468_v28  ;;  %2423 = vmatmul.msk.f32.vlgmr.msra.gmra.mxu0 %vm392_vm0, %v2989_v27  ;;  %2427 = vmatmul.msk.f32.vlgmr.msrb.gmra.mxu1 %vm392_vm0, %v2989_v27  ;;  %v2449_v28 = vld [vmem:[%s3491_s3 + $0x30] sm:$0xff] }
 0x12e   : > { %v463_v24 = vsel %vm462_vm12, %v2661_v11, %v459_v29  ;;  %2431 = vmatmul.msk.f32.vlgmr.msra.gmra.mxu2 %vm392_vm0, %v2989_v27  ;;  %v2448_v29 = vld [vmem:[%s3491_s3 + $0x28] sm:$0xff] }
 0x12f   : > { %v485_v32 = vmul.f32 %v463_v24, %v2923_v25  ;;  %v473_v33 = vsel %vm472_vm13, %v2663_v13, %v469_v30  ;;  %v2447_v30 = vld [vmem:[%s3491_s3 + $0x20] sm:$0xff] }
 0x130   : > { %v486_v36 = vmul.f32 %v473_v33, %v2931_v31  ;;  %v2642_v31 = vld [vmem:[%s3495_s7] ss:$0 sm:$0xff] }
 0x131   : > { %v493_v34 = vmul.f32 %v2639_v3, %v485_v32 }
 0x132   : > { %v494_v37 = vmul.f32 %v2639_v3, %v486_v36 }
 0x133   : > { %v2998_v35 = vadd.f32 %v2640_v6, %v493_v34 }
 0x134   : > { %v3007_v38 = vadd.f32 %v2640_v6, %v494_v37 }
 0x135   : > { %2424 = vmatmul.msk.f32.gmra.mxu0 %vm392_vm0, %v2998_v35  ;;  %2428 = vmatmul.msk.f32.gmra.mxu1 %vm392_vm0, %v2998_v35 }
 0x136   : > { %2432 = vmatmul.msk.f32.gmra.mxu2 %vm392_vm0, %v2998_v35 }
 0x13d   : > { %2425 = vmatmul.msk.f32.gmra.mxu0 %vm392_vm0, %v3007_v38  ;;  %2429 = vmatmul.msk.f32.gmra.mxu1 %vm392_vm0, %v3007_v38 }
 0x13e   : > { %2433 = vmatmul.msk.f32.gmra.mxu2 %vm392_vm0, %v3007_v38 }
 0x145   : > { %2430 = vmatmul.msk.f32.gmra.mxu1 %vm392_vm0, %v2984_v12 }
 0x146   : > { %2434 = vmatmul.msk.f32.gmra.mxu2 %vm392_vm0, %v2984_v12 }
 0x1a2   : > { %v550_v25 = vpop.f32.mrf.mxu1 }
 0x1a3   : > { %v551_v61 = vadd.f32 %v2641_v42, %v550_v25 }
 0x1aa   : > { %v541_v39 = vpop.f32.mrf.mxu0  ;;  %v578_v40 = vpop.f32.mrf.mxu1 }
 0x1ab   : > { %v579_v41 = vadd.f32 %v2642_v31, %v578_v40  ;;  %v542_v43 = vadd.f32 %v2641_v42, %v541_v39 }
 0x1ad   : > { %2435 = vmatpush.xpose.msk.msrb.mxu2 %vm627_vm14, %v579_v41 }
 0x1b0   : > { %2436 = vmatmul.msk.f32.vlgmr.msrb.gmra.mxu2 %vm627_vm14, %v542_v43 }
 0x1b1   : > { %v615_v44 = vpop.f32.mrf.mxu2 }
 0x1b2   : > { %v544_v45 = vpop.f32.mrf.mxu0  ;;  %v581_v46 = vpop.f32.mrf.mxu1  ;;  %v616_v60 = vadd.f32 %v2643_v49, %v615_v44 }
 0x1b3   : > { %v582_v47 = vadd.f32 %v2642_v31, %v581_v46  ;;  %v545_v48 = vadd.f32 %v2641_v42, %v544_v45 }
 0x1b5   : > { %2437 = vmatpush.xpose.msk.msra.mxu3 %vm627_vm14, %v582_v47 }
 0x1b8   : > { %2438 = vmatmul.msk.f32.vlgmr.msra.gmra.mxu3 %vm627_vm14, %v545_v48 }
 0x1b9   : > { %v618_v50 = vpop.f32.mrf.mxu2 }
 0x1ba   : > { %v619_v51 = vadd.f32 %v2643_v49, %v618_v50  ;;  %v584_v52 = vpop.f32.mrf.mxu1  ;;  %v547_v53 = vpop.f32.mrf.mxu0 }
 0x1bb   : > { %v585_v54 = vadd.f32 %v2642_v31, %v584_v52  ;;  %v548_v55 = vadd.f32 %v2641_v42, %v547_v53 }
 0x1bc   : > { %869 = vmatpush.msrb.mxu0 %v619_v51 }
 0x1bd   : > { %2439 = vmatpush.xpose.msk.msrb.mxu3 %vm627_vm14, %v585_v54 }
 0x1be   : > { %943 = vmatpush.msra.mxu0 %v2450_v26 }
 0x1c0   : > { %2440 = vmatmul.msk.f32.vlgmr.msrb.gmra.mxu3 %vm627_vm14, %v548_v55  ;;  %944 = vmatpush.msra.mxu0 %v2449_v28 }
 0x1c1   : > { %v621_v56 = vpop.f32.mrf.mxu2 }
 0x1c2   : > { %v622_v57 = vadd.f32 %v2643_v49, %v621_v56  ;;  %v587_v58 = vpop.f32.mrf.mxu1  ;;  %945 = vmatpush.msra.mxu0 %v2448_v29 }
 0x1c3   : > { %v588_v59 = vadd.f32 %v2642_v31, %v587_v58 }
 0x1c4   : > { %892 = vmatpush.msra.mxu1 %v622_v57  ;;  %946 = vmatpush.msra.mxu0 %v2447_v30 }
 0x1c5   : > { %2441 = vmatpush.xpose.msk.msra.mxu3 %vm627_vm14, %v588_v59 }
 0x1c8   : > { %2442 = vmatmul.msk.f32.vlgmr.msra.gmra.mxu3 %vm627_vm14, %v551_v61  ;;  %v2459_v61 = vld [vmem:[%s3492_s4 + $0x38] sm:$0xff] }
 0x1c9   : > { %846 = vmatpush.msrb.mxu3 %v616_v60  ;;  %v624_v62 = vpop.f32.mrf.mxu2 }
 0x1ca   : > { %v625_v63 = vadd.f32 %v2643_v49, %v624_v62  ;;  %v2458_v62 = vld [vmem:[%s3492_s4 + $0x30] sm:$0xff] }
 0x1cb   : > { %2593 = vmatpush.msra.mxu3 %v2450_v26 }
 0x1cc   : > { %915 = vmatpush.msra.mxu2 %v625_v63 }
 0x1cd   : > { %2594 = vmatpush.msra.mxu3 %v2449_v28 }
 0x1cf   : > { %2595 = vmatpush.msra.mxu3 %v2448_v29 }
 0x1d1   : > { %2596 = vmatpush.msra.mxu3 %v2447_v30 }
 0x233   : > { %v651_v0 = vpop.f32.mrf.mxu2 }
 0x234   : > { %v732_v1 = vsel %vm627_vm14, %v651_v0, -inf }
 0x235   : > { %733 = vmax.xlane.f32.xlu0 %v732_v1 }
 0x23b   : > { %v677_v2 = vpop.f32.mrf.mxu3 }
 0x23c   : > { %v735_v3 = vsel %vm627_vm14, %v677_v2, -inf }
 0x23d   : > { %736 = vmax.xlane.f32.xlu2 %v735_v3 }
 0x243   : > { %v703_v4 = vpop.f32.mrf.mxu3 }
 0x244   : > { %v738_v19 = vsel %vm627_vm14, %v703_v4, -inf }
 0x24b   : > { %v729_v5 = vpop.f32.mrf.mxu3 }
 0x24c   : > { %v741_v6 = vsel %vm627_vm14, %v729_v5, -inf }
 0x24d   : > { %742 = vmax.xlane.f32.xlu0 %v741_v6 }
 0x2a8   : > { %v734_v7 = vpop.xlane.xlu0 %733 }
 0x2a9   : > { %v744_v8 = vsub.f32 %v651_v0, %v734_v7  ;;  %v2457_v0 = vld [vmem:[%s3492_s4 + $0x28] sm:$0xff] }
 0x2ab   : > { %v748_v9 = vmul.f32 1.442695, %v744_v8 }
 0x2ad   : > { %2664 = vpow2.f32 %v748_v9 }
 0x2b0   : > { %v737_v10 = vpop.xlane.xlu2 %736 }
 0x2b1   : > { %v745_v11 = vsub.f32 %v677_v2, %v737_v10  ;;  %v2456_v2 = vld [vmem:[%s3492_s4 + $0x20] sm:$0xff] }
 0x2b3   : > { %v2665_v13 = vpop.eup %2664  ;;  %v750_v14 = vmul.f32 1.442695, %v745_v11 }
 0x2b4   : > { %v756_v15 = vsel %vm627_vm14, %v2665_v13, 0.0 }
 0x2b5   : > { %2666 = vpow2.f32 %v750_v14  ;;  %757 = vadd.xlane.f32.xlu2 %v756_v15  ;;  %v2467_v14 = vld [vmem:[%s3493_s5 + $0x30] sm:$0xff]  ;;  %v2466_v15 = vld [vmem:[%s3493_s5 + $0x28] sm:$0xff] }
 0x2bb   : > { %v3040_v16 = vpop.eup %2666 }
 0x2bc   : > { %v759_v18 = vsel %vm627_vm14, %v3040_v16, 0.0 }
 0x2bd   : > { %760 = vadd.xlane.f32.xlu1 %v759_v18  ;;  %739 = vmax.xlane.f32.xlu2 %v738_v19 }
 0x2c0   : > { %v743_v17 = vpop.xlane.xlu0 %742 }
 0x2c1   : > { %v747_v20 = vsub.f32 %v729_v5, %v743_v17 }
 0x2c3   : > { %v754_v21 = vmul.f32 1.442695, %v747_v20 }
 0x2c5   : > { %2668 = vpow2.f32 %v754_v21 }
 0x2cb   : > { %v3045_v22 = vpop.eup %2668 }
 0x2cc   : > { %v765_v23 = vsel %vm627_vm14, %v3045_v22, 0.0 }
 0x2cd   : > { %766 = vadd.xlane.f32.xlu1 %v765_v23 }
 0x328   : > { %v758_v24 = vpop.xlane.xlu2 %757 }
 0x329   : > { %2670 = vrcp.f32 %v758_v24  ;;  %v779_v31 = vand.u32 2147483648, %v758_v24  ;;  %v777_v41 = vand.u32 2147483647, %v758_v24  ;;  %vm773_vm1 = vweird.f32 %v758_v24 }
 0x32b   : > { %v780_v44 = vor.u32 1.1754944e-38, %v779_v31  ;;  %vm778_vm3 = vcmp.eq.f32.partialorder %v777_v41, 8.507059e+37  ;;  %v2644_v31 = vld [vmem:[%s3494_s6 + $0x1] ss:$0 sm:$0xff] }
 0x32f   : > { %v2671_v32 = vpop.eup %2670 }
 0x330   : > { %v769_v33 = vmul.f32 %v2671_v32, %v758_v24  ;;  %v740_v34 = vpop.xlane.xlu2 %739  ;;  %v761_v36 = vpop.xlane.xlu1 %760  ;;  %vm774_vm15 = vweird.f32 %v2671_v32 }
 0x331   : > { %v746_v37 = vsub.f32 %v703_v4, %v740_v34  ;;  %2672 = vrcp.f32 %v761_v36  ;;  %vm775_vm2 = vmor %vm773_vm1, %vm774_vm15  ;;  %v794_v52 = vand.u32 2147483648, %v761_v36  ;;  %v792_v54 = vand.u32 2147483647, %v761_v36 }
 0x332   : > { %v770_v25 = vsub.f32 1.0, %v769_v33  ;;  %vm788_vm5 = vweird.f32 %v761_v36 }
 0x333   : > { %v752_v39 = vmul.f32 1.442695, %v746_v37  ;;  %v795_v56 = vor.u32 1.1754944e-38, %v794_v52  ;;  %vm793_vm7 = vcmp.eq.f32.partialorder %v792_v54, 8.507059e+37 }
 0x334   : > { %v771_v40 = vmul.f32 %v2671_v32, %v770_v25 }
 0x335   : > { %2674 = vpow2.f32 %v752_v39 }
 0x336   : > { %v772_v42 = vadd.f32 %v2671_v32, %v771_v40 }
 0x337   : > { %v2673_v43 = vpop.eup %2672 }
 0x338   : > { %v776_v45 = vsel %vm775_vm2, %v2671_v32, %v772_v42  ;;  %v784_v46 = vmul.f32 %v2673_v43, %v761_v36  ;;  %vm789_vm4 = vweird.f32 %v2673_v43  ;;  %v2645_v36 = vld [vmem:[%s3495_s7 + $0x1] ss:$0 sm:$0xff] }
 0x339   : > { %v781_v47 = vsel %vm778_vm3, %v780_v44, %v776_v45  ;;  %vm790_vm6 = vmor %vm788_vm5, %vm789_vm4 }
 0x33a   : > { %v785_v48 = vsub.f32 1.0, %v784_v46  ;;  %v782_v49 = vmul.f32 %v2665_v13, %v781_v47  ;;  %v2468_v13 = vld [vmem:[%s3493_s5 + $0x38] sm:$0xff] }
 0x33b   : > { %v3061_v50 = vpop.eup %2674  ;;  %1021 = vmatpush.msrb.mxu1 %v2468_v13 }
 0x33c   : > { %v786_v51 = vmul.f32 %v2673_v43, %v785_v48  ;;  %2443 = vmatmul.msk.f32.vlgmr.msrb.gmra.mxu3 %vm627_vm14, %v782_v49  ;;  %v762_v53 = vsel %vm627_vm14, %v3061_v50, 0.0 }
 0x33d   : > { %763 = vadd.xlane.f32.xlu0 %v762_v53  ;;  %1022 = vmatpush.msrb.mxu1 %v2467_v14  ;;  %v2646_v53 = vld [vmem:[%s3496_s8 + $0x1] ss:$0 sm:$0xff] }
 0x33e   : > { %v787_v55 = vadd.f32 %v2673_v43, %v786_v51 }
 0x33f   : > { %1023 = vmatpush.msrb.mxu1 %v2466_v15 }
 0x340   : > { %v767_v57 = vpop.xlane.xlu1 %766  ;;  %v791_v58 = vsel %vm790_vm6, %v2673_v43, %v787_v55 }
 0x341   : > { %2676 = vrcp.f32 %v767_v57  ;;  %v796_v59 = vsel %vm793_vm7, %v795_v56, %v791_v58  ;;  %v824_v4 = vand.u32 2147483648, %v767_v57  ;;  %v822_v6 = vand.u32 2147483647, %v767_v57 }
 0x342   : > { %v797_v60 = vmul.f32 %v3040_v16, %v796_v59  ;;  %vm818_vm9 = vweird.f32 %v767_v57  ;;  %v2465_v16 = vld [vmem:[%s3493_s5 + $0x20] sm:$0xff] }
 0x343   : > { %v825_v8 = vor.u32 1.1754944e-38, %v824_v4  ;;  %vm823_vm11 = vcmp.eq.f32.partialorder %v822_v6, 8.507059e+37  ;;  %1024 = vmatpush.msrb.mxu1 %v2465_v16 }
 0x344   : > { %2454 = vmatmul.msk.f32.vlgmr.msra.gmra.mxu3 %vm392_vm0, %v3007_v38  ;;  %2444 = vmatmul.msk.f32.vlgmr.msrb.gmra.mxu0 %vm627_vm14, %v797_v60 }
 0x345   : > { %982 = vmatpush.msrb.mxu0 %v2459_v61 }
 0x347   : > { %v2677_v63 = vpop.eup %2676  ;;  %983 = vmatpush.msrb.mxu0 %v2458_v62 }
 0x348   : > { %v814_v1 = vmul.f32 %v2677_v63, %v767_v57  ;;  %vm819_vm8 = vweird.f32 %v2677_v63 }
 0x349   : > { %984 = vmatpush.msrb.mxu0 %v2457_v0  ;;  %vm820_vm10 = vmor %vm818_vm9, %vm819_vm8 }
 0x34a   : > { %v815_v3 = vsub.f32 1.0, %v814_v1 }
 0x34b   : > { %985 = vmatpush.msrb.mxu0 %v2456_v2 }
 0x34c   : > { %v816_v5 = vmul.f32 %v2677_v63, %v815_v3  ;;  %2455 = vmatmul.msk.f32.gmra.mxu3 %vm392_vm0, %v2984_v12  ;;  %2452 = vmatmul.msk.f32.vlgmr.msra.gmra.mxu0 %vm392_vm0, %v2989_v27 }
 0x34e   : > { %v817_v7 = vadd.f32 %v2677_v63, %v816_v5 }
 0x350   : > { %v821_v9 = vsel %vm820_vm10, %v2677_v63, %v817_v7 }
 0x351   : > { %v826_v10 = vsel %vm823_vm11, %v825_v8, %v821_v9 }
 0x352   : > { %v827_v11 = vmul.f32 %v3045_v22, %v826_v10 }
 0x354   : > { %2446 = vmatmul.msk.f32.vlgmr.msra.gmra.mxu2 %vm627_vm14, %v827_v11  ;;  %2453 = vmatmul.msk.f32.gmra.mxu0 %vm392_vm0, %v2998_v35 }
 0x35c   : > { %2461 = vmatmul.msk.f32.vlgmr.msrb.gmra.mxu0 %vm392_vm0, %v2989_v27 }
 0x364   : > { %2462 = vmatmul.msk.f32.gmra.mxu0 %vm392_vm0, %v2998_v35 }
 0x36c   : > { %2463 = vmatmul.msk.f32.gmra.mxu0 %vm392_vm0, %v3007_v38 }
 0x374   : > { %2464 = vmatmul.msk.f32.gmra.mxu0 %vm392_vm0, %v2984_v12 }
 0x3b0   : > { %v764_v18 = vpop.xlane.xlu0 %763 }
 0x3b1   : > { %2678 = vrcp.f32 %v764_v18  ;;  %v809_v21 = vand.u32 2147483648, %v764_v18  ;;  %v807_v23 = vand.u32 2147483647, %v764_v18  ;;  %vm803_vm13 = vweird.f32 %v764_v18 }
 0x3b3   : > { %v810_v28 = vor.u32 1.1754944e-38, %v809_v21  ;;  %vm808_vm1 = vcmp.eq.f32.partialorder %v807_v23, 8.507059e+37  ;;  %v2498_v23 = vld [vmem:[%s3491_s3 + $0x58] sm:$0xff] }
 0x3b7   : > { %v2679_v19 = vpop.eup %2678 }
 0x3b8   : > { %v799_v17 = vmul.f32 %v2679_v19, %v764_v18  ;;  %vm804_vm12 = vweird.f32 %v2679_v19 }
 0x3b9   : > { %vm805_vm15 = vmor %vm803_vm13, %vm804_vm12 }
 0x3ba   : > { %v800_v20 = vsub.f32 1.0, %v799_v17 }
 0x3bc   : > { %v801_v22 = vmul.f32 %v2679_v19, %v800_v20 }
 0x3be   : > { %v802_v26 = vadd.f32 %v2679_v19, %v801_v22 }
 0x3bf   : > { %v3127_v40 = vpop.f32.mrf.mxu3 }
 0x3c0   : > { %v806_v29 = vsel %vm805_vm15, %v2679_v19, %v802_v26  ;;  %v2497_v26 = vld [vmem:[%s3491_s3 + $0x50] sm:$0xff] }
 0x3c1   : > { %v811_v30 = vsel %vm808_vm1, %v810_v28, %v806_v29  ;;  %v3110_v24 = vpop.f32.mrf.mxu0  ;;  %v2496_v28 = vld [vmem:[%s3491_s3 + $0x48] sm:$0xff]  ;;  %v2495_v29 = vld [vmem:[%s3491_s3 + $0x40] sm:$0xff] }
 0x3c2   : > { %v812_v32 = vmul.f32 %v3061_v50, %v811_v30  ;;  %v2507_v30 = vld [vmem:[%s3492_s4 + $0x58] sm:$0xff] }
 0x3c4   : > { %2445 = vmatmul.msk.f32.vlgmr.msra.gmra.mxu1 %vm627_vm14, %v812_v32  ;;  %v2506_v32 = vld [vmem:[%s3492_s4 + $0x50] sm:$0xff] }
 0x3c7   : > { %v954_v44 = vpop.f32.mrf.mxu3 }
 0x3c8   : > { %v955_v47 = vadd.f32 %v2644_v31, %v954_v44 }
 0x3c9   : > { %v948_v33 = vpop.f32.mrf.mxu0 }
 0x3ca   : > { %v949_v39 = vadd.f32 %v2644_v31, %v948_v33  ;;  %v2505_v33 = vld [vmem:[%s3492_s4 + $0x48] sm:$0xff] }
 0x3cc   : > { %2470 = vmatmul.msk.f32.vlgmr.msrb.gmra.mxu1 %vm392_vm0, %v2989_v27 }
 0x3cf   : > { %v957_v49 = vpop.f32.mrf.mxu3 }
 0x3d0   : > { %v958_v51 = vadd.f32 %v2644_v31, %v957_v49 }
 0x3d1   : > { %v951_v34 = vpop.f32.mrf.mxu0 }
 0x3d2   : > { %v952_v43 = vadd.f32 %v2644_v31, %v951_v34 }
 0x3d4   : > { %2471 = vmatmul.msk.f32.gmra.mxu1 %vm392_vm0, %v2998_v35 }
 0x3d7   : > { %v3143_v60 = vpop.f32.mrf.mxu2 }
 0x3d9   : > { %v987_v37 = vpop.f32.mrf.mxu0 }
 0x3da   : > { %v988_v25 = vadd.f32 %v2645_v36, %v987_v37 }
 0x3dc   : > { %2472 = vmatmul.msk.f32.gmra.mxu1 %vm392_vm0, %v3007_v38  ;;  %2474 = vmatpush.xpose.msk.msrb.mxu2 %vm627_vm14, %v988_v25 }
 0x3df   : > { %2475 = vmatmul.msk.f32.vlgmr.msrb.gmra.mxu2 %vm627_vm14, %v949_v39 }
 0x3e1   : > { %v990_v41 = vpop.f32.mrf.mxu0 }
 0x3e2   : > { %v991_v42 = vadd.f32 %v2645_v36, %v990_v41 }
 0x3e4   : > { %2473 = vmatmul.msk.f32.gmra.mxu1 %vm392_vm0, %v2984_v12  ;;  %2476 = vmatpush.xpose.msk.msra.mxu2 %vm627_vm14, %v991_v42 }
 0x3e7   : > { %2477 = vmatmul.msk.f32.vlgmr.msra.gmra.mxu2 %vm627_vm14, %v952_v43 }
 0x3e9   : > { %v993_v45 = vpop.f32.mrf.mxu0 }
 0x3ea   : > { %v994_v46 = vadd.f32 %v2645_v36, %v993_v45 }
 0x3ec   : > { %2478 = vmatpush.xpose.msk.msrb.mxu2 %vm627_vm14, %v994_v46 }
 0x3ef   : > { %2479 = vmatmul.msk.f32.vlgmr.msrb.gmra.mxu2 %vm627_vm14, %v955_v47 }
 0x3f1   : > { %v996_v48 = vpop.f32.mrf.mxu0 }
 0x3f2   : > { %v997_v50 = vadd.f32 %v2645_v36, %v996_v48  ;;  %v2504_v36 = vld [vmem:[%s3492_s4 + $0x40] sm:$0xff] }
 0x3f4   : > { %2480 = vmatpush.xpose.msk.msra.mxu2 %vm627_vm14, %v997_v50 }
 0x3f7   : > { %2481 = vmatmul.msk.f32.vlgmr.msra.gmra.mxu2 %vm627_vm14, %v958_v51 }
 0x441   : > { %v3138_v52 = vpop.f32.mrf.mxu1 }
 0x449   : > { %v1026_v54 = vpop.f32.mrf.mxu1 }
 0x44a   : > { %v1027_v55 = vadd.f32 %v2646_v53, %v1026_v54 }
 0x44c   : > { %1256 = vmatpush.msrb.mxu3 %v1027_v55 }
 0x451   : > { %v1029_v56 = vpop.f32.mrf.mxu1 }
 0x452   : > { %v1030_v57 = vadd.f32 %v2646_v53, %v1029_v56 }
 0x454   : > { %1279 = vmatpush.msra.mxu0 %v1030_v57 }
 0x459   : > { %v1032_v58 = vpop.f32.mrf.mxu1 }
 0x45a   : > { %v1033_v59 = vadd.f32 %v2646_v53, %v1032_v58 }
 0x45c   : > { %1302 = vmatpush.msra.mxu1 %v1033_v59 }
 0x45e   : > { %1436 = vmatpush.msrb.mxu1 %v2498_v23 }
 0x460   : > { %1437 = vmatpush.msrb.mxu1 %v2497_v26 }
 0x461   : > { %v1035_v61 = vpop.f32.mrf.mxu1 }
 0x462   : > { %v1036_v62 = vadd.f32 %v2646_v53, %v1035_v61  ;;  %v1061_v63 = vpop.f32.mrf.mxu2  ;;  %1438 = vmatpush.msrb.mxu1 %v2496_v28 }
 0x463   : > { %v1142_v4 = vsel %vm627_vm14, %v1061_v63, -inf }
 0x464   : > { %1325 = vmatpush.msrb.mxu2 %v1036_v62  ;;  %1439 = vmatpush.msrb.mxu1 %v2495_v29 }
 0x466   : > { %1475 = vmatpush.msra.mxu2 %v2507_v30 }
 0x468   : > { %1476 = vmatpush.msra.mxu2 %v2506_v32 }
 0x46a   : > { %v3145_v0 = vpop.f32.mrf.mxu2  ;;  %1477 = vmatpush.msra.mxu2 %v2505_v33 }
 0x46b   : > { %v1145_v22 = vsel %vm627_vm14, %v3145_v0, -inf }
 0x46c   : > { %1478 = vmatpush.msra.mxu2 %v2504_v36 }
 0x472   : > { %v1113_v1 = vpop.f32.mrf.mxu2 }
 0x473   : > { %v1148_v2 = vsel %vm627_vm14, %v1113_v1, -inf }
 0x474   : > { %1149 = vmax.xlane.f32.xlu2 %v1148_v2 }
 0x47a   : > { %v1139_v3 = vpop.f32.mrf.mxu2 }
 0x47b   : > { %v1151_v5 = vsel %vm627_vm14, %v1139_v3, -inf }
 0x47c   : > { %1143 = vmax.xlane.f32.xlu2 %v1142_v4  ;;  %1152 = vmax.xlane.f32.xlu1 %v1151_v5 }
 0x4e7   : > { %v1150_v6 = vpop.xlane.xlu2 %1149 }
 0x4e8   : > { %v1156_v7 = vsub.f32 %v1113_v1, %v1150_v6 }
 0x4ea   : > { %v1162_v8 = vmul.f32 1.442695, %v1156_v7 }
 0x4ec   : > { %2680 = vpow2.f32 %v1162_v8 }
 0x4ef   : > { %v1144_v9 = vpop.xlane.xlu2 %1143  ;;  %v1153_v10 = vpop.xlane.xlu1 %1152 }
 0x4f0   : > { %v1154_v11 = vsub.f32 %v1061_v63, %v1144_v9  ;;  %v1157_v13 = vsub.f32 %v1139_v3, %v1153_v10 }
 0x4f2   : > { %v2681_v14 = vpop.eup %2680  ;;  %v1158_v15 = vmul.f32 1.442695, %v1154_v11  ;;  %v1164_v16 = vmul.f32 1.442695, %v1157_v13 }
 0x4f3   : > { %v1172_v18 = vsel %vm627_vm14, %v2681_v14, 0.0 }
 0x4f4   : > { %2682 = vpow2.f32 %v1158_v15  ;;  %1173 = vadd.xlane.f32.xlu1 %v1172_v18  ;;  %v920_v18 = vld [vmem:[%s3497_s9] sm:$0xff] }
 0x4f5   : > { %2684 = vpow2.f32 %v1164_v16  ;;  %v2486_v16 = vld [vmem:[%s3497_s9 + $0x8] sm:$0xff]  ;;  %1400 = vmatpush.msrb.mxu0 %v920_v18 }
 0x4f6   : > { %1359 = vmatpush.msra.mxu3 %v2486_v16 }
 0x4fa   : > { %v3151_v19 = vpop.eup %2682 }
 0x4fb   : > { %v3153_v17 = vpop.eup %2684  ;;  %v1166_v20 = vsel %vm627_vm14, %v3151_v19, 0.0 }
 0x4fc   : > { %1167 = vadd.xlane.f32.xlu1 %v1166_v20  ;;  %v1175_v21 = vsel %vm627_vm14, %v3153_v17, 0.0 }
 0x4fd   : > { %1176 = vadd.xlane.f32.xlu0 %v1175_v21 }
 0x505   : > { %1146 = vmax.xlane.f32.xlu0 %v1145_v22 }
 0x567   : > { %v1174_v34 = vpop.xlane.xlu1 %1173 }
 0x568   : > { %2686 = vrcp.f32 %v1174_v34  ;;  %v1219_v42 = vand.u32 2147483648, %v1174_v34  ;;  %v1217_v44 = vand.u32 2147483647, %v1174_v34  ;;  %vm1213_vm3 = vweird.f32 %v1174_v34 }
 0x56a   : > { %v1220_v47 = vor.u32 1.1754944e-38, %v1219_v42  ;;  %vm1218_vm5 = vcmp.eq.f32.partialorder %v1217_v44, 8.507059e+37 }
 0x56e   : > { %v2687_v37 = vpop.eup %2686 }
 0x56f   : > { %v1209_v25 = vmul.f32 %v2687_v37, %v1174_v34  ;;  %v1168_v31 = vpop.xlane.xlu1 %1167  ;;  %vm1214_vm2 = vweird.f32 %v2687_v37 }
 0x570   : > { %v1177_v39 = vpop.xlane.xlu0 %1176  ;;  %2688 = vrcp.f32 %v1168_v31  ;;  %vm1215_vm4 = vmor %vm1213_vm3, %vm1214_vm2  ;;  %v1187_v59 = vand.u32 2147483647, %v1168_v31  ;;  %v1189_v61 = vand.u32 2147483648, %v1168_v31  ;;  %vm1183_vm8 = vweird.f32 %v1168_v31 }
 0x571   : > { %v1210_v41 = vsub.f32 1.0, %v1209_v25  ;;  %2690 = vrcp.f32 %v1177_v39  ;;  %v1234_v62 = vand.u32 2147483648, %v1177_v39  ;;  %v1232_v3 = vand.u32 2147483647, %v1177_v39 }
 0x572   : > { %vm1228_vm9 = vweird.f32 %v1177_v39  ;;  %vm1188_vm12 = vcmp.eq.f32.partialorder %v1187_v59, 8.507059e+37 }
 0x573   : > { %v1211_v43 = vmul.f32 %v2687_v37, %v1210_v41  ;;  %v1235_v6 = vor.u32 1.1754944e-38, %v1234_v62  ;;  %vm1233_vm13 = vcmp.eq.f32.partialorder %v1232_v3, 8.507059e+37  ;;  %v2557_v3 = vld [vmem:[%s3493_s5 + $0x60] sm:$0xff] }
 0x575   : > { %v1212_v45 = vadd.f32 %v2687_v37, %v1211_v43 }
 0x576   : > { %v2689_v46 = vpop.eup %2688 }
 0x577   : > { %v2691_v48 = vpop.eup %2690  ;;  %v1216_v49 = vsel %vm1215_vm4, %v2687_v37, %v1212_v45  ;;  %v1179_v50 = vmul.f32 %v2689_v46, %v1168_v31  ;;  %vm1184_vm6 = vweird.f32 %v2689_v46  ;;  %v2648_v31 = vld [vmem:[%s3495_s7 + $0x2] ss:$0 sm:$0xff] }
 0x578   : > { %v1221_v51 = vsel %vm1218_vm5, %v1220_v47, %v1216_v49  ;;  %v1224_v53 = vmul.f32 %v2691_v48, %v1177_v39  ;;  %v1147_v54 = vpop.xlane.xlu0 %1146  ;;  %vm1229_vm7 = vweird.f32 %v2691_v48  ;;  %vm1185_vm10 = vmor %vm1183_vm8, %vm1184_vm6  ;;  %v2647_v45 = vld [vmem:[%s3494_s6 + $0x2] ss:$0 sm:$0xff] }
 0x579   : > { %v1180_v55 = vsub.f32 1.0, %v1179_v50  ;;  %v1155_v56 = vsub.f32 %v3145_v0, %v1147_v54  ;;  %v1222_v57 = vmul.f32 %v2681_v14, %v1221_v51  ;;  %v1190_v0 = vor.u32 1.1754944e-38, %v1189_v61  ;;  %vm1230_vm11 = vmor %vm1228_vm9, %vm1229_vm7 }
 0x57a   : > { %v1225_v58 = vsub.f32 1.0, %v1224_v53 }
 0x57b   : > { %v1181_v63 = vmul.f32 %v2689_v46, %v1180_v55  ;;  %v1160_v1 = vmul.f32 1.442695, %v1155_v56  ;;  %2484 = vmatmul.msk.f32.vlgmr.msra.gmra.mxu1 %vm627_vm14, %v1222_v57  ;;  %v2515_v55 = vld [vmem:[%s3493_s5 + $0x50] sm:$0xff]  ;;  %v2513_v56 = vld [vmem:[%s3493_s5 + $0x40] sm:$0xff] }
 0x57c   : > { %v1226_v2 = vmul.f32 %v2691_v48, %v1225_v58 }
 0x57d   : > { %v1182_v4 = vadd.f32 %v2689_v46, %v1181_v63  ;;  %2692 = vpow2.f32 %v1160_v1  ;;  %v2560_v63 = vld [vmem:[%s3493_s5 + $0x78] sm:$0xff]  ;;  %v2559_v1 = vld [vmem:[%s3493_s5 + $0x70] sm:$0xff] }
 0x57e   : > { %v1227_v5 = vadd.f32 %v2691_v48, %v1226_v2  ;;  %v2558_v2 = vld [vmem:[%s3493_s5 + $0x68] sm:$0xff] }
 0x57f   : > { %v1186_v7 = vsel %vm1185_vm10, %v2689_v46, %v1182_v4 }
 0x580   : > { %v1231_v8 = vsel %vm1230_vm11, %v2691_v48, %v1227_v5  ;;  %v1191_v9 = vsel %vm1188_vm12, %v1190_v0, %v1186_v7 }
 0x581   : > { %v1236_v10 = vsel %vm1233_vm13, %v1235_v6, %v1231_v8  ;;  %v1192_v11 = vmul.f32 %v3151_v19, %v1191_v9 }
 0x582   : > { %v1237_v13 = vmul.f32 %v3153_v17, %v1236_v10 }
 0x583   : > { %v2693_v14 = vpop.eup %2692  ;;  %2482 = vmatmul.msk.f32.vlgmr.msrb.gmra.mxu3 %vm627_vm14, %v1192_v11  ;;  %2500 = vmatmul.msk.f32.vlgmr.msrb.gmra.mxu1 %vm392_vm0, %v2989_v27 }
 0x584   : > { %2485 = vmatmul.msk.f32.vlgmr.msrb.gmra.mxu2 %vm627_vm14, %v1237_v13  ;;  %v1169_v15 = vsel %vm627_vm14, %v2693_v14, 0.0 }
 0x585   : > { %1170 = vadd.xlane.f32.xlu2 %v1169_v15 }
 0x58b   : > { %2501 = vmatmul.msk.f32.gmra.mxu1 %vm392_vm0, %v2998_v35 }
 0x58c   : > { %2509 = vmatmul.msk.f32.vlgmr.msra.gmra.mxu2 %vm392_vm0, %v2989_v27 }
 0x593   : > { %2502 = vmatmul.msk.f32.gmra.mxu1 %vm392_vm0, %v3007_v38 }
 0x594   : > { %2510 = vmatmul.msk.f32.gmra.mxu2 %vm392_vm0, %v2998_v35 }
 0x59b   : > { %2503 = vmatmul.msk.f32.gmra.mxu1 %vm392_vm0, %v2984_v12 }
 0x59c   : > { %2511 = vmatmul.msk.f32.gmra.mxu2 %vm392_vm0, %v3007_v38 }
 0x5a4   : > { %2512 = vmatmul.msk.f32.gmra.mxu2 %vm392_vm0, %v2984_v12 }
 0x5f8   : > { %v1171_v19 = vpop.xlane.xlu2 %1170  ;;  %v1304_v22 = vpop.f32.mrf.mxu1 }
 0x5f9   : > { %2694 = vrcp.f32 %v1171_v19  ;;  %v1204_v23 = vand.u32 2147483648, %v1171_v19  ;;  %v1202_v28 = vand.u32 2147483647, %v1171_v19  ;;  %vm1198_vm1 = vweird.f32 %v1171_v19 }
 0x5fb   : > { %v1205_v32 = vor.u32 1.1754944e-38, %v1204_v23  ;;  %vm1203_vm3 = vcmp.eq.f32.partialorder %v1202_v28, 8.507059e+37 }
 0x5ff   : > { %v2695_v17 = vpop.eup %2694 }
 0x600   : > { %v1194_v20 = vmul.f32 %v2695_v17, %v1171_v19  ;;  %vm1199_vm15 = vweird.f32 %v2695_v17  ;;  %v1441_v25 = vpop.f32.mrf.mxu1 }
 0x601   : > { %vm1200_vm2 = vmor %vm1198_vm1, %vm1199_vm15 }
 0x602   : > { %v1195_v21 = vsub.f32 1.0, %v1194_v20 }
 0x604   : > { %v1196_v26 = vmul.f32 %v2695_v17, %v1195_v21 }
 0x606   : > { %v1197_v29 = vadd.f32 %v2695_v17, %v1196_v26  ;;  %v1258_v30 = vpop.f32.mrf.mxu3  ;;  %v2649_v26 = vld [vmem:[%s3496_s8 + $0x2] ss:$0 sm:$0xff] }
 0x607   : > { %v1327_v33 = vpop.f32.mrf.mxu2  ;;  %2487 = vmatmul.msk.f32.vlgmr.msra.gmra.mxu3 %vm627_vm14, %v1258_v30 }
 0x608   : > { %v1201_v34 = vsel %vm1200_vm2, %v2695_v17, %v1197_v29  ;;  %v1444_v42 = vpop.f32.mrf.mxu1 }
 0x609   : > { %v1206_v36 = vsel %vm1203_vm3, %v1205_v32, %v1201_v34  ;;  %v1445_v46 = vadd.f32 %v2647_v45, %v1444_v42 }
 0x60a   : > { %v1207_v37 = vmul.f32 %v2693_v14, %v1206_v36 }
 0x60c   : > { %2483 = vmatmul.msk.f32.vlgmr.msra.gmra.mxu0 %vm627_vm14, %v1207_v37 }
 0x60f   : > { %v1480_v39 = vpop.f32.mrf.mxu2 }
 0x610   : > { %v1481_v41 = vadd.f32 %v2648_v31, %v1480_v39  ;;  %v1447_v48 = vpop.f32.mrf.mxu1 }
 0x612   : > { %2522 = vmatpush.xpose.msk.msra.mxu0 %vm627_vm14, %v1481_v41 }
 0x614   : > { %2491 = vmatmul.msk.f32.vlgmr.msrb.gmra.mxu0 %vm627_vm14, %v3127_v40  ;;  %v1448_v40 = vadd.f32 %v2647_v45, %v1447_v48 }
 0x617   : > { %v1483_v43 = vpop.f32.mrf.mxu2 }
 0x618   : > { %v1484_v44 = vadd.f32 %v2648_v31, %v1483_v43  ;;  %v1450_v53 = vpop.f32.mrf.mxu1 }
 0x619   : > { %v1451_v54 = vadd.f32 %v2647_v45, %v1450_v53  ;;  %v2542_v53 = vld [vmem:[%s3491_s3 + $0x78] sm:$0xff] }
 0x61a   : > { %2524 = vmatpush.xpose.msk.msra.mxu1 %vm627_vm14, %v1484_v44 }
 0x61c   : > { %2492 = vmatmul.msk.f32.gmra.mxu0 %vm627_vm14, %v3110_v24  ;;  %v1442_v24 = vadd.f32 %v2647_v45, %v1441_v25 }
 0x61d   : > { %2525 = vmatmul.msk.f32.vlgmr.msra.gmra.mxu1 %vm627_vm14, %v1445_v46 }
 0x61f   : > { %v1486_v47 = vpop.f32.mrf.mxu2 }
 0x620   : > { %v1487_v49 = vadd.f32 %v2648_v31, %v1486_v47 }
 0x622   : > { %2526 = vmatpush.xpose.msk.msrb.mxu2 %vm627_vm14, %v1487_v49 }
 0x624   : > { %2493 = vmatmul.msk.f32.gmra.mxu0 %vm627_vm14, %v3138_v52  ;;  %v2516_v52 = vld [vmem:[%s3493_s5 + $0x58] sm:$0xff] }
 0x625   : > { %2527 = vmatmul.msk.f32.vlgmr.msrb.gmra.mxu2 %vm627_vm14, %v1448_v40  ;;  %1514 = vmatpush.msrb.mxu3 %v2516_v52  ;;  %v3323_v40 = vld [vmem:[%s3496_s8 + $0x3] ss:$0 sm:$0xff] }
 0x627   : > { %v1489_v50 = vpop.f32.mrf.mxu2  ;;  %1515 = vmatpush.msrb.mxu3 %v2515_v55  ;;  %v2540_v55 = vld [vmem:[%s3491_s3 + $0x68] sm:$0xff] }
 0x628   : > { %v1490_v51 = vadd.f32 %v2648_v31, %v1489_v50 }
 0x62a   : > { %2528 = vmatpush.xpose.msk.msrb.mxu0 %vm627_vm14, %v1490_v51 }
 0x62c   : > { %2494 = vmatmul.msk.f32.gmra.mxu0 %vm627_vm14, %v3143_v60  ;;  %v2514_v60 = vld [vmem:[%s3493_s5 + $0x48] sm:$0xff] }
 0x62d   : > { %1516 = vmatpush.msrb.mxu3 %v2514_v60 }
 0x62f   : > { %1517 = vmatpush.msrb.mxu3 %v2513_v56  ;;  %v2539_v56 = vld [vmem:[%s3491_s3 + $0x60] sm:$0xff] }
 0x631   : > { %1970 = vmatpush.msra.mxu3 %v2560_v63 }
 0x633   : > { %1971 = vmatpush.msra.mxu3 %v2559_v1 }
 0x634   : > { %2523 = vmatmul.msk.f32.vlgmr.msra.gmra.mxu0 %vm627_vm14, %v1442_v24 }
 0x635   : > { %1972 = vmatpush.msra.mxu3 %v2558_v2 }
 0x637   : > { %1973 = vmatpush.msra.mxu3 %v2557_v3 }
 0x63c   : > { %2529 = vmatmul.msk.f32.vlgmr.msrb.gmra.mxu0 %vm627_vm14, %v1451_v54  ;;  %v2541_v54 = vld [vmem:[%s3491_s3 + $0x70] sm:$0xff] }
 0x689   : > { %v1281_v57 = vpop.f32.mrf.mxu0 }
 0x68a   : > { %2488 = vmatmul.msk.f32.gmra.mxu3 %vm627_vm14, %v1281_v57  ;;  %v3293_v11 = vpop.f32.mrf.mxu3 }
 0x691   : > { %v3251_v58 = vpop.f32.mrf.mxu0 }
 0x692   : > { %2489 = vmatmul.msk.f32.gmra.mxu3 %vm627_vm14, %v1304_v22 }
 0x699   : > { %v3254_v59 = vpop.f32.mrf.mxu0 }
 0x69a   : > { %2490 = vmatmul.msk.f32.gmra.mxu3 %vm627_vm14, %v1327_v33  ;;  %v1580_v61 = vpop.f32.mrf.mxu1 }
 0x69b   : > { %v1638_v62 = vsel %vm627_vm14, %v1580_v61, -inf }
 0x69c   : > { %1639 = vmax.xlane.f32.xlu1 %v1638_v62 }
 0x6a1   : > { %v3270_v4 = vpop.f32.mrf.mxu0 }
 0x6a2   : > { %2518 = vmatmul.msk.f32.vlgmr.msrb.gmra.mxu3 %vm392_vm0, %v2989_v27 }
 0x6a8   : > { %v1606_v5 = vpop.f32.mrf.mxu2 }
 0x6a9   : > { %v3274_v0 = vpop.f32.mrf.mxu0  ;;  %v1641_v6 = vsel %vm627_vm14, %v1606_v5, -inf }
 0x6aa   : > { %1642 = vmax.xlane.f32.xlu2 %v1641_v6  ;;  %2519 = vmatmul.msk.f32.gmra.mxu3 %vm392_vm0, %v2998_v35 }
 0x6b1   : > { %v1554_v7 = vpop.f32.mrf.mxu0 }
 0x6b2   : > { %2520 = vmatmul.msk.f32.gmra.mxu3 %vm392_vm0, %v3007_v38  ;;  %v1635_v8 = vsel %vm627_vm14, %v1554_v7, -inf }
 0x6b3   : > { %1636 = vmax.xlane.f32.xlu0 %v1635_v8 }
 0x6b9   : > { %v1632_v9 = vpop.f32.mrf.mxu0 }
 0x6ba   : > { %2521 = vmatmul.msk.f32.gmra.mxu3 %vm392_vm0, %v2984_v12  ;;  %v1644_v10 = vsel %vm627_vm14, %v1632_v9, -inf }
 0x6bb   : > { %1645 = vmax.xlane.f32.xlu0 %v1644_v10 }
 0x6c2   : > { %2562 = vmatmul.msk.f32.vlgmr.msra.gmra.mxu3 %vm392_vm0, %v2989_v27 }
 0x6ca   : > { %2563 = vmatmul.msk.f32.gmra.mxu3 %vm392_vm0, %v2998_v35 }
 0x6d2   : > { %2564 = vmatmul.msk.f32.gmra.mxu3 %vm392_vm0, %v3007_v38 }
 0x6da   : > { %2565 = vmatmul.msk.f32.gmra.mxu3 %vm392_vm0, %v2984_v12 }
 0x70d   : > { %v3295_v13 = vpop.f32.mrf.mxu3 }
 0x70f   : > { %v1640_v14 = vpop.xlane.xlu1 %1639 }
 0x710   : > { %v1648_v15 = vsub.f32 %v1580_v61, %v1640_v14 }
 0x712   : > { %v1653_v16 = vmul.f32 1.442695, %v1648_v15 }
 0x714   : > { %2696 = vpow2.f32 %v1653_v16 }
 0x715   : > { %v3297_v18 = vpop.f32.mrf.mxu3 }
 0x71a   : > { %v3299_v19 = vpop.eup %2696 }
 0x71b   : > { %v1662_v17 = vsel %vm627_vm14, %v3299_v19, 0.0 }
 0x71c   : > { %1663 = vadd.xlane.f32.xlu2 %v1662_v17 }
 0x71d   : > { %v1643_v20 = vpop.xlane.xlu2 %1642  ;;  %v3303_v21 = vpop.f32.mrf.mxu3 }
 0x71e   : > { %v1649_v22 = vsub.f32 %v1606_v5, %v1643_v20 }
 0x720   : > { %v1655_v23 = vmul.f32 1.442695, %v1649_v22 }
 0x722   : > { %2698 = vpow2.f32 %v1655_v23 }
 0x725   : > { %v1519_v28 = vpop.f32.mrf.mxu3 }
 0x726   : > { %v1520_v29 = vadd.f32 %v2649_v26, %v1519_v28  ;;  %v1637_v30 = vpop.xlane.xlu0 %1636 }
 0x727   : > { %v1647_v32 = vsub.f32 %v1554_v7, %v1637_v30 }
 0x728   : > { %v3308_v33 = vpop.eup %2698  ;;  %1749 = vmatpush.msrb.mxu1 %v1520_v29 }
 0x729   : > { %v1651_v34 = vmul.f32 1.442695, %v1647_v32  ;;  %v1665_v36 = vsel %vm627_vm14, %v3308_v33, 0.0 }
 0x72a   : > { %1666 = vadd.xlane.f32.xlu0 %v1665_v36 }
 0x72b   : > { %2700 = vpow2.f32 %v1651_v34 }
 0x72d   : > { %v1522_v37 = vpop.f32.mrf.mxu3 }
 0x72e   : > { %v1523_v25 = vadd.f32 %v2649_v26, %v1522_v37  ;;  %v1646_v31 = vpop.xlane.xlu0 %1645 }
 0x72f   : > { %v1650_v39 = vsub.f32 %v1632_v9, %v1646_v31 }
 0x730   : > { %1772 = vmatpush.msra.mxu2 %v1523_v25 }
 0x731   : > { %v3312_v41 = vpop.eup %2700  ;;  %v1657_v42 = vmul.f32 1.442695, %v1650_v39 }
 0x732   : > { %v1659_v43 = vsel %vm627_vm14, %v3312_v41, 0.0 }
 0x733   : > { %2702 = vpow2.f32 %v1657_v42  ;;  %1660 = vadd.xlane.f32.xlu1 %v1659_v43 }
 0x735   : > { %v1525_v44 = vpop.f32.mrf.mxu3 }
 0x736   : > { %v1526_v45 = vadd.f32 %v2649_v26, %v1525_v44 }
 0x738   : > { %1795 = vmatpush.msra.mxu0 %v1526_v45 }
 0x739   : > { %v3316_v46 = vpop.eup %2702 }
 0x73a   : > { %v1668_v47 = vsel %vm627_vm14, %v3316_v46, 0.0  ;;  %1892 = vmatpush.msrb.mxu0 %v2542_v53 }
 0x73b   : > { %1669 = vadd.xlane.f32.xlu1 %v1668_v47 }
 0x73c   : > { %1893 = vmatpush.msrb.mxu0 %v2541_v54 }
 0x73d   : > { %v1528_v48 = vpop.f32.mrf.mxu3 }
 0x73e   : > { %v1529_v49 = vadd.f32 %v2649_v26, %v1528_v48  ;;  %1894 = vmatpush.msrb.mxu0 %v2540_v55 }
 0x740   : > { %1818 = vmatpush.msra.mxu1 %v1529_v49  ;;  %1895 = vmatpush.msrb.mxu0 %v2539_v56 }
 0x745   : > { %v1975_v50 = vpop.f32.mrf.mxu3 }
 0x746   : > { %v1976_v51 = vadd.f32 %v3323_v40, %v1975_v50 }
 0x748   : > { %2205 = vmatpush.msrb.mxu3 %v1976_v51  ;;  %v2550_v51 = vld [vmem:[%s3492_s4 + $0x70] sm:$0xff] }
 0x78f   : > { %v1664_v24 = vpop.xlane.xlu2 %1663 }
 0x790   : > { %2704 = vrcp.f32 %v1664_v24  ;;  %v1697_v61 = vand.u32 2147483648, %v1664_v24  ;;  %v1695_v63 = vand.u32 2147483647, %v1664_v24  ;;  %vm1691_vm5 = vweird.f32 %v1664_v24 }
 0x792   : > { %v1698_v3 = vor.u32 1.1754944e-38, %v1697_v61  ;;  %vm1696_vm7 = vcmp.eq.f32.partialorder %v1695_v63, 8.507059e+37  ;;  %v1978_v63 = vpop.f32.mrf.mxu3 }
 0x796   : > { %v2705_v52 = vpop.eup %2704 }
 0x797   : > { %v1687_v60 = vmul.f32 %v2705_v52, %v1664_v24  ;;  %vm1692_vm4 = vweird.f32 %v2705_v52 }
 0x798   : > { %vm1693_vm6 = vmor %vm1691_vm5, %vm1692_vm4 }
 0x799   : > { %v1688_v57 = vsub.f32 1.0, %v1687_v60 }
 0x79b   : > { %v1689_v62 = vmul.f32 %v2705_v52, %v1688_v57 }
 0x79d   : > { %v1690_v1 = vadd.f32 %v2705_v52, %v1689_v62  ;;  %v1667_v2 = vpop.xlane.xlu0 %1666 }
 0x79e   : > { %2706 = vrcp.f32 %v1667_v2  ;;  %v1712_v15 = vand.u32 2147483648, %v1667_v2  ;;  %v1710_v17 = vand.u32 2147483647, %v1667_v2  ;;  %vm1706_vm9 = vweird.f32 %v1667_v2 }
 0x79f   : > { %v1694_v5 = vsel %vm1693_vm6, %v2705_v52, %v1690_v1  ;;  %v2548_v52 = vld [vmem:[%s3492_s4 + $0x60] sm:$0xff] }
 0x7a0   : > { %v1699_v6 = vsel %vm1696_vm7, %v1698_v3, %v1694_v5  ;;  %v1713_v22 = vor.u32 1.1754944e-38, %v1712_v15  ;;  %vm1711_vm11 = vcmp.eq.f32.partialorder %v1710_v17, 8.507059e+37  ;;  %v1979_v5 = vadd.f32 %v3323_v40, %v1978_v63 }
 0x7a1   : > { %v1700_v7 = vmul.f32 %v3299_v19, %v1699_v6  ;;  %v2651_v6 = vld [vmem:[%s3494_s6 + $0x3] ss:$0 sm:$0xff] }
 0x7a3   : > { %2531 = vmatmul.msk.f32.vlgmr.msra.gmra.mxu2 %vm627_vm14, %v1700_v7 }
 0x7a4   : > { %v2707_v8 = vpop.eup %2706 }
 0x7a5   : > { %v1702_v9 = vmul.f32 %v2707_v8, %v1667_v2  ;;  %vm1707_vm8 = vweird.f32 %v2707_v8 }
 0x7a6   : > { %v1661_v10 = vpop.xlane.xlu1 %1660  ;;  %vm1708_vm10 = vmor %vm1706_vm9, %vm1707_vm8 }
 0x7a7   : > { %v1703_v14 = vsub.f32 1.0, %v1702_v9  ;;  %2708 = vrcp.f32 %v1661_v10  ;;  %v1682_v34 = vand.u32 2147483648, %v1661_v10  ;;  %v1680_v37 = vand.u32 2147483647, %v1661_v10 }
 0x7a8   : > { %vm1676_vm13 = vweird.f32 %v1661_v10 }
 0x7a9   : > { %v1704_v16 = vmul.f32 %v2707_v8, %v1703_v14  ;;  %v1683_v39 = vor.u32 1.1754944e-38, %v1682_v34  ;;  %vm1681_vm1 = vcmp.eq.f32.partialorder %v1680_v37, 8.507059e+37  ;;  %v1406_v34 = vadd.f32 %v3254_v59, %v3295_v13 }
 0x7ab   : > { %v1705_v20 = vadd.f32 %v2707_v8, %v1704_v16 }
 0x7ad   : > { %v2709_v23 = vpop.eup %2708  ;;  %v1709_v26 = vsel %vm1708_vm10, %v2707_v8, %v1705_v20  ;;  %v1981_v8 = vpop.f32.mrf.mxu3 }
 0x7ae   : > { %v1714_v28 = vsel %vm1711_vm11, %v1713_v22, %v1709_v26  ;;  %v1672_v19 = vmul.f32 %v2709_v23, %v1661_v10  ;;  %v1670_v29 = vpop.xlane.xlu1 %1669  ;;  %vm1677_vm12 = vweird.f32 %v2709_v23  ;;  %v1982_v16 = vadd.f32 %v3323_v40, %v1981_v8 }
 0x7af   : > { %2710 = vrcp.f32 %v1670_v29  ;;  %v1715_v32 = vmul.f32 %v3308_v33, %v1714_v28  ;;  %vm1678_vm15 = vmor %vm1676_vm13, %vm1677_vm12  ;;  %v2551_v33 = vld [vmem:[%s3492_s4 + $0x78] sm:$0xff]  ;;  %v1727_v48 = vand.u32 2147483648, %v1670_v29  ;;  %v1725_v50 = vand.u32 2147483647, %v1670_v29 }
 0x7b0   : > { %v1673_v30 = vsub.f32 1.0, %v1672_v19  ;;  %vm1721_vm3 = vweird.f32 %v1670_v29 }
 0x7b1   : > { %2532 = vmatmul.msk.f32.vlgmr.msra.gmra.mxu0 %vm627_vm14, %v1715_v32  ;;  %v1728_v53 = vor.u32 1.1754944e-38, %v1727_v48  ;;  %vm1726_vm5 = vcmp.eq.f32.partialorder %v1725_v50, 8.507059e+37 }
 0x7b2   : > { %v1674_v36 = vmul.f32 %v2709_v23, %v1673_v30 }
 0x7b4   : > { %v1675_v25 = vadd.f32 %v2709_v23, %v1674_v36 }
 0x7b5   : > { %v2711_v31 = vpop.eup %2710  ;;  %v1984_v20 = vpop.f32.mrf.mxu3 }
 0x7b6   : > { %v1679_v42 = vsel %vm1678_vm15, %v2709_v23, %v1675_v25  ;;  %v1717_v43 = vmul.f32 %v2711_v31, %v1670_v29  ;;  %vm1722_vm2 = vweird.f32 %v2711_v31  ;;  %v1985_v28 = vadd.f32 %v3323_v40, %v1984_v20 }
 0x7b7   : > { %v1684_v44 = vsel %vm1681_vm1, %v1683_v39, %v1679_v42  ;;  %vm1723_vm4 = vmor %vm1721_vm3, %vm1722_vm2  ;;  %v1403_v29 = vadd.f32 %v3251_v58, %v3293_v11  ;;  %v1409_v40 = vadd.f32 %v3270_v4, %v3297_v18  ;;  %v1412_v39 = vadd.f32 %v3274_v0, %v3303_v21 }
 0x7b8   : > { %v1718_v45 = vsub.f32 1.0, %v1717_v43  ;;  %v1685_v47 = vmul.f32 %v3312_v41, %v1684_v44  ;;  %v2549_v41 = vld [vmem:[%s3492_s4 + $0x68] sm:$0xff] }
 0x7b9   : > { %2544 = vmatmul.msk.f32.vlgmr.msrb.gmra.mxu0 %vm392_vm0, %v2989_v27 }
 0x7ba   : > { %v1719_v49 = vmul.f32 %v2711_v31, %v1718_v45  ;;  %2530 = vmatmul.msk.f32.vlgmr.msrb.gmra.mxu1 %vm627_vm14, %v1685_v47 }
 0x7bb   : > { %1931 = vmatpush.msrb.mxu1 %v2551_v33 }
 0x7bc   : > { %v1720_v24 = vadd.f32 %v2711_v31, %v1719_v49 }
 0x7bd   : > { %1932 = vmatpush.msrb.mxu1 %v2550_v51 }
 0x7be   : > { %v1724_v54 = vsel %vm1723_vm4, %v2711_v31, %v1720_v24 }
 0x7bf   : > { %v1729_v55 = vsel %vm1726_vm5, %v1728_v53, %v1724_v54  ;;  %1933 = vmatpush.msrb.mxu1 %v2549_v41 }
 0x7c0   : > { %v1730_v60 = vmul.f32 %v3316_v46, %v1729_v55  ;;  %v2534_v46 = vld [vmem:[%s3497_s9 + $0x10] sm:$0xff] }
 0x7c1   : > { %1934 = vmatpush.msrb.mxu1 %v2548_v52  ;;  %2545 = vmatmul.msk.f32.gmra.mxu0 %vm392_vm0, %v2998_v35 }
 0x7c2   : > { %2533 = vmatmul.msk.f32.vlgmr.msra.gmra.mxu1 %vm627_vm14, %v1730_v60  ;;  %1852 = vmatpush.msrb.mxu2 %v2534_v46 }
 0x7c9   : > { %2546 = vmatmul.msk.f32.gmra.mxu0 %vm392_vm0, %v3007_v38 }
 0x7ca   : > { %2553 = vmatmul.msk.f32.vlgmr.msrb.gmra.mxu1 %vm392_vm0, %v2989_v27 }
 0x7d1   : > { %2547 = vmatmul.msk.f32.gmra.mxu0 %vm392_vm0, %v2984_v12 }
 0x7d2   : > { %2554 = vmatmul.msk.f32.gmra.mxu1 %vm392_vm0, %v2998_v35 }
 0x7da   : > { %2555 = vmatmul.msk.f32.gmra.mxu1 %vm392_vm0, %v3007_v38  ;;  %v2652_v38 = vld [vmem:[%s3495_s7 + $0x3] ss:$0 sm:$0xff] }
 0x7e2   : > { %2556 = vmatmul.msk.f32.gmra.mxu1 %vm392_vm0, %v2984_v12 }
 0x826   : > { %v1774_v27 = vpop.f32.mrf.mxu2 }
 0x82e   : > { %v1797_v57 = vpop.f32.mrf.mxu0 }
 0x836   : > { %v1897_v35 = vpop.f32.mrf.mxu0 }
 0x837   : > { %v1751_v56 = vpop.f32.mrf.mxu1  ;;  %v1898_v9 = vadd.f32 %v2651_v6, %v1897_v35 }
 0x838   : > { %2535 = vmatmul.msk.f32.vlgmr.msrb.gmra.mxu2 %vm627_vm14, %v1751_v56 }
 0x83e   : > { %v1900_v1 = vpop.f32.mrf.mxu0 }
 0x83f   : > { %v1820_v61 = vpop.f32.mrf.mxu1  ;;  %v1901_v7 = vadd.f32 %v2651_v6, %v1900_v1 }
 0x840   : > { %2536 = vmatmul.msk.f32.gmra.mxu2 %vm627_vm14, %v1774_v27 }
 0x846   : > { %v1903_v10 = vpop.f32.mrf.mxu0 }
 0x847   : > { %v1936_v62 = vpop.f32.mrf.mxu1  ;;  %v1904_v17 = vadd.f32 %v2651_v6, %v1903_v10 }
 0x848   : > { %v1937_v12 = vadd.f32 %v2652_v38, %v1936_v62  ;;  %2537 = vmatmul.msk.f32.gmra.mxu2 %vm627_vm14, %v1797_v57 }
 0x84a   : > { %2566 = vmatpush.xpose.msk.msra.mxu2 %vm627_vm14, %v1937_v12 }
 0x84e   : > { %v1906_v23 = vpop.f32.mrf.mxu0 }
 0x84f   : > { %v1939_v2 = vpop.f32.mrf.mxu1  ;;  %v1907_v19 = vadd.f32 %v2651_v6, %v1906_v23 }
 0x850   : > { %v1940_v3 = vadd.f32 %v2652_v38, %v1939_v2  ;;  %2538 = vmatmul.msk.f32.gmra.mxu2 %vm627_vm14, %v1820_v61 }
 0x852   : > { %2568 = vmatpush.xpose.msk.msra.mxu0 %vm627_vm14, %v1940_v3 }
 0x855   : > { %2569 = vmatmul.msk.f32.vlgmr.msra.gmra.mxu0 %vm627_vm14, %v1901_v7 }
 0x856   : > { %2228 = vmatpush.msrb.mxu0 %v1979_v5 }
 0x857   : > { %v1942_v14 = vpop.f32.mrf.mxu1 }
 0x858   : > { %v1943_v15 = vadd.f32 %v2652_v38, %v1942_v14  ;;  %2567 = vmatmul.msk.f32.vlgmr.msra.gmra.mxu2 %vm627_vm14, %v1898_v9 }
 0x85a   : > { %2570 = vmatpush.xpose.msk.msra.mxu1 %vm627_vm14, %v1943_v15 }
 0x85d   : > { %2571 = vmatmul.msk.f32.vlgmr.msra.gmra.mxu1 %vm627_vm14, %v1904_v17 }
 0x85e   : > { %2251 = vmatpush.msrb.mxu1 %v1982_v16 }
 0x85f   : > { %v1945_v22 = vpop.f32.mrf.mxu1 }
 0x860   : > { %v1946_v26 = vadd.f32 %v2652_v38, %v1945_v22 }
 0x862   : > { %2572 = vmatpush.xpose.msk.msrb.mxu2 %vm627_vm14, %v1946_v26 }
 0x865   : > { %2573 = vmatmul.msk.f32.vlgmr.msrb.gmra.mxu2 %vm627_vm14, %v1907_v19 }
 0x866   : > { %2274 = vmatpush.msra.mxu2 %v1985_v28 }
 0x8bb   : > { %v1854_v30 = vpop.f32.mrf.mxu2 }
 0x8bc   : > { %v3400_v32 = vadd.f32 %v1854_v30, %v1403_v29 }
 0x8c3   : > { %v1857_v36 = vpop.f32.mrf.mxu2 }
 0x8c4   : > { %v3404_v37 = vadd.f32 %v1857_v36, %v1406_v34 }
 0x8cb   : > { %v1860_v25 = vpop.f32.mrf.mxu2 }
 0x8cc   : > { %v3408_v31 = vadd.f32 %v1860_v25, %v1409_v40 }
 0x8d2   : > { %v2036_v42 = vpop.f32.mrf.mxu0 }
 0x8d3   : > { %v1863_v58 = vpop.f32.mrf.mxu2  ;;  %v2094_v11 = vsel %vm627_vm14, %v2036_v42, -inf }
 0x8d4   : > { %v3413_v43 = vadd.f32 %v1863_v58, %v1412_v39  ;;  %2095 = vmax.xlane.f32.xlu0 %v2094_v11 }
 0x8da   : > { %v2062_v59 = vpop.f32.mrf.mxu1 }
 0x8db   : > { %v2010_v13 = vpop.f32.mrf.mxu2  ;;  %v2097_v44 = vsel %vm627_vm14, %v2062_v59, -inf }
 0x8dc   : > { %2098 = vmax.xlane.f32.xlu1 %v2097_v44  ;;  %v2091_v4 = vsel %vm627_vm14, %v2010_v13, -inf }
 0x8dd   : > { %2092 = vmax.xlane.f32.xlu2 %v2091_v4 }
 0x8e8   : > { %v2088_v18 = vpop.f32.mrf.mxu2 }
 0x8e9   : > { %v2100_v45 = vsel %vm627_vm14, %v2088_v18, -inf }
 0x8ea   : > { %2101 = vmax.xlane.f32.xlu2 %v2100_v45 }
 0x947   : > { %v2096_v0 = vpop.xlane.xlu0 %2095 }
 0x948   : > { %v2104_v21 = vsub.f32 %v2036_v42, %v2096_v0 }
 0x94a   : > { %v2109_v47 = vmul.f32 1.442695, %v2104_v21 }
 0x94c   : > { %2712 = vpow2.f32 %v2109_v47 }
 0x94f   : > { %v2099_v33 = vpop.xlane.xlu1 %2098 }
 0x950   : > { %v2105_v48 = vsub.f32 %v2062_v59, %v2099_v33  ;;  %v2093_v49 = vpop.xlane.xlu2 %2092 }
 0x951   : > { %v2103_v50 = vsub.f32 %v2010_v13, %v2093_v49 }
 0x952   : > { %v2713_v51 = vpop.eup %2712  ;;  %v2111_v24 = vmul.f32 1.442695, %v2105_v48 }
 0x953   : > { %v2107_v41 = vmul.f32 1.442695, %v2103_v50  ;;  %v2118_v53 = vsel %vm627_vm14, %v2713_v51, 0.0 }
 0x954   : > { %2714 = vpow2.f32 %v2111_v24  ;;  %2119 = vadd.xlane.f32.xlu1 %v2118_v53  ;;  %v2578_v24 = vld [vmem:[%s3497_s9 + $0x18] sm:$0xff] }
 0x955   : > { %2716 = vpow2.f32 %v2107_v41  ;;  %2308 = vmatpush.msra.mxu3 %v2578_v24 }
 0x95a   : > { %v3419_v54 = vpop.eup %2714 }
 0x95b   : > { %v3421_v52 = vpop.eup %2716  ;;  %v2121_v55 = vsel %vm627_vm14, %v3419_v54, 0.0 }
 0x95c   : > { %2122 = vadd.xlane.f32.xlu2 %v2121_v55  ;;  %v2115_v60 = vsel %vm627_vm14, %v3421_v52, 0.0  ;;  %v2653_v55 = vld [vmem:[%s3498_s10] ss:$0 sm:$0xff] }
 0x95d   : > { %2116 = vadd.xlane.f32.xlu0 %v2115_v60  ;;  %v2102_v46 = vpop.xlane.xlu2 %2101 }
 0x95e   : > { %v2106_v56 = vsub.f32 %v2088_v18, %v2102_v46 }
 0x960   : > { %v2113_v57 = vmul.f32 1.442695, %v2106_v56 }
 0x962   : > { %2718 = vpow2.f32 %v2113_v57 }
 0x968   : > { %v3427_v27 = vpop.eup %2718 }
 0x969   : > { %v2124_v61 = vsel %vm627_vm14, %v3427_v27, 0.0 }
 0x96a   : > { %2125 = vadd.xlane.f32.xlu0 %v2124_v61 }
 0x9c7   : > { %v2120_v35 = vpop.xlane.xlu1 %2119 }
 0x9c8   : > { %2720 = vrcp.f32 %v2120_v35  ;;  %v2153_v2 = vand.u32 2147483648, %v2120_v35  ;;  %v2151_v5 = vand.u32 2147483647, %v2120_v35  ;;  %vm2147_vm7 = vweird.f32 %v2120_v35 }
 0x9ca   : > { %v2154_v8 = vor.u32 1.1754944e-38, %v2153_v2  ;;  %vm2152_vm9 = vcmp.eq.f32.partialorder %v2151_v5, 8.507059e+37 }
 0x9ce   : > { %v2721_v38 = vpop.eup %2720 }
 0x9cf   : > { %v2143_v62 = vmul.f32 %v2721_v38, %v2120_v35  ;;  %v2123_v12 = vpop.xlane.xlu2 %2122  ;;  %vm2148_vm6 = vweird.f32 %v2721_v38 }
 0x9d0   : > { %2722 = vrcp.f32 %v2123_v12  ;;  %v2117_v63 = vpop.xlane.xlu0 %2116  ;;  %vm2149_vm8 = vmor %vm2147_vm7, %vm2148_vm6  ;;  %v2168_v22 = vand.u32 2147483648, %v2123_v12  ;;  %v2166_v28 = vand.u32 2147483647, %v2123_v12  ;;  %vm2162_vm12 = vweird.f32 %v2123_v12 }
 0x9d1   : > { %v2144_v1 = vsub.f32 1.0, %v2143_v62  ;;  %2724 = vrcp.f32 %v2117_v63  ;;  %v2138_v19 = vand.u32 2147483648, %v2117_v63  ;;  %v2136_v30 = vand.u32 2147483647, %v2117_v63 }
 0x9d2   : > { %v2169_v40 = vor.u32 1.1754944e-38, %v2168_v22  ;;  %vm2132_vm15 = vweird.f32 %v2117_v63  ;;  %vm2167_vm1 = vcmp.eq.f32.partialorder %v2166_v28, 8.507059e+37 }
 0x9d3   : > { %v2145_v3 = vmul.f32 %v2721_v38, %v2144_v1  ;;  %v2139_v42 = vor.u32 1.1754944e-38, %v2138_v19  ;;  %vm2137_vm3 = vcmp.eq.f32.partialorder %v2136_v30, 8.507059e+37 }
 0x9d5   : > { %v2146_v6 = vadd.f32 %v2721_v38, %v2145_v3 }
 0x9d6   : > { %v2723_v7 = vpop.eup %2722 }
 0x9d7   : > { %v2725_v9 = vpop.eup %2724  ;;  %v2150_v10 = vsel %vm2149_vm8, %v2721_v38, %v2146_v6  ;;  %v2158_v14 = vmul.f32 %v2723_v7, %v2123_v12  ;;  %vm2163_vm10 = vweird.f32 %v2723_v7 }
 0x9d8   : > { %v2155_v15 = vsel %vm2152_vm9, %v2154_v8, %v2150_v10  ;;  %v2128_v16 = vmul.f32 %v2725_v9, %v2117_v63  ;;  %vm2133_vm11 = vweird.f32 %v2725_v9  ;;  %vm2164_vm13 = vmor %vm2162_vm12, %vm2163_vm10 }
 0x9d9   : > { %v2156_v17 = vmul.f32 %v2713_v51, %v2155_v15  ;;  %v2159_v20 = vsub.f32 1.0, %v2158_v14  ;;  %vm2134_vm2 = vmor %vm2132_vm15, %vm2133_vm11 }
 0x9da   : > { %v2129_v23 = vsub.f32 1.0, %v2128_v16 }
 0x9db   : > { %v2160_v26 = vmul.f32 %v2723_v7, %v2159_v20  ;;  %2575 = vmatmul.msk.f32.vlgmr.msrb.gmra.mxu0 %vm627_vm14, %v2156_v17 }
 0x9dc   : > { %v2130_v29 = vmul.f32 %v2725_v9, %v2129_v23 }
 0x9dd   : > { %v2161_v34 = vadd.f32 %v2723_v7, %v2160_v26  ;;  %v2126_v36 = vpop.xlane.xlu0 %2125 }
 0x9de   : > { %v2131_v25 = vadd.f32 %v2725_v9, %v2130_v29  ;;  %2726 = vrcp.f32 %v2126_v36  ;;  %v2183_v0 = vand.u32 2147483648, %v2126_v36  ;;  %v2181_v47 = vand.u32 2147483647, %v2126_v36 }
 0x9df   : > { %v2165_v39 = vsel %vm2164_vm13, %v2723_v7, %v2161_v34  ;;  %vm2177_vm5 = vweird.f32 %v2126_v36 }
 0x9e0   : > { %v2170_v58 = vsel %vm2167_vm1, %v2169_v40, %v2165_v39  ;;  %v2135_v11 = vsel %vm2134_vm2, %v2725_v9, %v2131_v25  ;;  %v2184_v48 = vor.u32 1.1754944e-38, %v2183_v0  ;;  %vm2182_vm7 = vcmp.eq.f32.partialorder %v2181_v47, 8.507059e+37 }
 0x9e1   : > { %v2171_v59 = vmul.f32 %v3419_v54, %v2170_v58  ;;  %v2140_v13 = vsel %vm2137_vm3, %v2139_v42, %v2135_v11 }
 0x9e2   : > { %v2141_v44 = vmul.f32 %v3421_v52, %v2140_v13 }
 0x9e3   : > { %2576 = vmatmul.msk.f32.vlgmr.msrb.gmra.mxu1 %vm627_vm14, %v2171_v59 }
 0x9e4   : > { %v2727_v4 = vpop.eup %2726  ;;  %2574 = vmatmul.msk.f32.vlgmr.msrb.gmra.mxu3 %vm627_vm14, %v2141_v44 }
 0x9e5   : > { %v2173_v18 = vmul.f32 %v2727_v4, %v2126_v36  ;;  %vm2178_vm4 = vweird.f32 %v2727_v4 }
 0x9e6   : > { %vm2179_vm6 = vmor %vm2177_vm5, %vm2178_vm4 }
 0x9e7   : > { %v2174_v45 = vsub.f32 1.0, %v2173_v18 }
 0x9e9   : > { %v2175_v21 = vmul.f32 %v2727_v4, %v2174_v45 }
 0x9eb   : > { %v2176_v33 = vadd.f32 %v2727_v4, %v2175_v21 }
 0x9ed   : > { %v2180_v49 = vsel %vm2179_vm6, %v2727_v4, %v2176_v33 }
 0x9ee   : > { %v2185_v50 = vsel %vm2182_vm7, %v2184_v48, %v2180_v49 }
 0x9ef   : > { %v2186_v51 = vmul.f32 %v3427_v27, %v2185_v50 }
 0x9f1   : > { %2577 = vmatmul.msk.f32.vlgmr.msra.gmra.mxu2 %vm627_vm14, %v2186_v51 }
 0xa58   : > { %v2230_v53 = vpop.f32.mrf.mxu0 }
 0xa60   : > { %v2253_v54 = vpop.f32.mrf.mxu1 }
 0xa67   : > { %v2207_v41 = vpop.f32.mrf.mxu3 }
 0xa68   : > { %2579 = vmatmul.msk.f32.vlgmr.msra.gmra.mxu3 %vm627_vm14, %v2207_v41 }
 0xa70   : > { %2580 = vmatmul.msk.f32.gmra.mxu3 %vm627_vm14, %v2230_v53 }
 0xa74   : > { %v2276_v52 = vpop.f32.mrf.mxu2 }
 0xa78   : > { %2581 = vmatmul.msk.f32.gmra.mxu3 %vm627_vm14, %v2253_v54 }
 0xa80   : > { %2582 = vmatmul.msk.f32.gmra.mxu3 %vm627_vm14, %v2276_v52 }
 0xaeb   : > { %v2310_v60 = vpop.f32.mrf.mxu3 }
 0xaec   : > { %v2322_v46 = vadd.f32 %v2310_v60, %v3400_v32 }
 0xaee   : > { %v2330_v56 = vadd.f32 %v2653_v55, %v2322_v46 }
 0xaf0   : > { %2334 = vst.msk [vmem:[%s380_s30] sm:$0xff] %vm392_vm0, %v2330_v56 }
 0xaf3   : > { %v2313_v57 = vpop.f32.mrf.mxu3 }
 0xaf4   : > { %v2323_v27 = vadd.f32 %v2313_v57, %v3404_v37 }
 0xaf6   : > { %v2331_v61 = vadd.f32 %v2653_v55, %v2323_v27 }
 0xaf8   : > { %2335 = vst.msk [vmem:[%s380_s30 + $0x8] sm:$0xff] %vm392_vm0, %v2331_v61 }
 0xafb   : > { %v2316_v35 = vpop.f32.mrf.mxu3 }
 0xafc   : > { %v2324_v38 = vadd.f32 %v2316_v35, %v3408_v31 }
 0xafe   : > { %v2332_v62 = vadd.f32 %v2653_v55, %v2324_v38 }
 0xb00   : > { %2336 = vst.msk [vmem:[%s380_s30 + $0x10] sm:$0xff] %vm392_vm0, %v2332_v62 }
 0xb03   : > { %v2319_v32 = vpop.f32.mrf.mxu3 }
 0xb04   : > { %v2325_v37 = vadd.f32 %v2319_v32, %v3413_v43 }
 0xb06   : > { %v2333_v12 = vadd.f32 %v2653_v55, %v2325_v37 }
 0xb08   : > { %2337 = vst.msk [vmem:[%s380_s30 + $0x18] sm:$0xff] %vm392_vm0, %v2333_v12 }
 0xb09   : > { %2755 = shalt.err (!%p2752_p3)
}
 0xb0a   : > { %s2793_s22 = smov 128   ;;  %s2794_s30 = smov 8  }
 0xb0b   : > { %2597 = dma.vmem_to_hbm [thread:$0]  (%p2893_p5), %s2352_s16, 512, %s2354_s24, %s2339_s25, %s2793_s22, %s2793_s22, %s2794_s30  }
 0xb0c PF: > { %p2603_p4 = scmp.ge.s32.totalorder %s2790_s20, 2  ;;  %s2368_s12 = sand.u32 1, %s2778_s17  }
 0xb0d   : > { %s2369_s0 = scalar_lea.sflag [#allocation3], %s2368_s12 }
 0xb0e   : > { %p2600_p7 = pnand %p2603_p4, %p2897_p6 }
 0xb10   : > { %p2601_p8 = pneg %p2600_p7 }
 0xb12   : > { %2773 = dma.done.wait (%p2601_p8), %s2369_s0, 512  }
 0xb13   : > { %2775 = vsyncadd (%p2601_p8), %s2369_s0, 4294966784  ;;  %p21_p9 = scmp.ge.s32.totalorder %s2880_s23, 4   ;;  %s3504_s17 = smov %s2782_s18 }
 0xb14   : > { %s3505_s18 = smov %s2786_s19  ;;  %s3506_s19 = smov %s2891_s26 }
 0xb15   : > { %s3507_s20 = smov %s2880_s23  ;;  %23 = sbr.rel (!%p21_p9) target bundleno = 5 (0x5), region = 120 }
 0xb1a   :  { %2375 = vsyncpa [#allocation3], 1 }
 0xb1b   :  { %2377 = vsyncpa [#allocation3 + $0x1], 1 }

</bundles_post_ra>
